<compile_context>
chip_gen: v7x
topology: tpu7x:2x2x1
jax: 0.10.0
libtpu: 0.0.40
codegen_flags: <defaults>
</compile_context>

<pallas_src>
import functools
import math

import jax
import jax.numpy as jnp
import numpy as np
from jax.experimental import pallas as pl
from jax.experimental.pallas import tpu as pltpu


def _round_up(x, m):
    return (x + m - 1) // m * m


def _conv_relu_kernel(*refs, NB, KH, KW, TH, Wo, Cin, CPAD, TC, CT):
    """One grid step = (batch n, output-row tile ht, output-channel tile ct).

    refs[0:NB]   : NB consecutive TH-row blocks of the zero-padded NHWC input
                   (block indices ht, ht+1, ...) — together they cover the
                   TH+KH-1 padded rows this row tile needs.   (TH, Wp, Cin)
    refs[NB]     : full flattened weight (KH*KW*CPAD, Cout_pad), VMEM-resident.
    refs[NB + 1] : full bias (1, Cout_pad), VMEM-resident, f32.
    refs[NB + 2] : output tile (TH*Wo, TC).
    refs[NB + 3] : im2col scratch (TH*Wo, KH*KW*CPAD), compute dtype.
    """
    x_refs = refs[:NB]
    w_ref = refs[NB]
    b_ref = refs[NB + 1]
    o_ref = refs[NB + 2]
    col_ref = refs[NB + 3]

    ct = pl.program_id(2)
    KK = KH * KW

    # Build the im2col tile once per (n, ht); it is reused for every Cout tile.
    # INVARIANT: this relies on the Cout-tile axis being the LAST grid axis and
    # "arbitrary" (sequential on one core) — do not reorder the grid.
    @pl.when(ct == 0)
    def _build_im2col():
        if CPAD != Cin:
            # Zero only the padded tap-slot lanes (they face zero weight rows
            # but must not hold garbage).  Data lanes are fully rewritten
            # below.  Never runs when Cin % 128 == 0.
            zeros = jnp.zeros((TH * Wo, CPAD - Cin), col_ref.dtype)
            for k in range(KK):
                col_ref[:, k * CPAD + Cin:(k + 1) * CPAD] = zeros
        for kh in range(KH):
            r = 0
            while r < TH:                          # static Python loop
                src = r + kh                       # window row for output row r
                b = src // TH                      # which input block holds it
                lo = src - b * TH                  # row inside that block
                run = min(TH - r, TH - lo)         # contiguous rows from block b
                slab = x_refs[b][lo:lo + run, :, :]            # (run, Wp, Cin)
                for kw in range(KW):
                    k = kh * KW + kw
                    col_ref[r * Wo:(r + run) * Wo, k * CPAD:k * CPAD + Cin] = (
                        slab[:, kw:kw + Wo, :]
                        .reshape(run * Wo, Cin).astype(col_ref.dtype))
                r += run

    # Weight / bias are fully VMEM-resident; slice this Cout tile in-kernel.
    if CT == 1:
        w_tile = w_ref[...]
        b_tile = b_ref[...]
    else:
        off = pl.multiple_of(ct * TC, TC)
        w_tile = w_ref[:, pl.ds(off, TC)]
        b_tile = b_ref[:, pl.ds(off, TC)]

    # Single deep-K MXU matmul (bf16 in, f32 accumulate), then bias + ReLU.
    acc = jnp.dot(col_ref[...], w_tile, preferred_element_type=jnp.float32)
    acc = acc + b_tile.astype(jnp.float32)
    acc = jnp.maximum(acc, 0.0)
    o_ref[...] = acc.astype(o_ref.dtype)


def conv_module_forward(x_nchw, weight_oihw, bias, *, padding=1,
                        compute_dtype=jnp.bfloat16, block_m=None,
                        block_c=None, pad_cout_lanes=True):
    """ConvModule.forward: Conv2d(stride=1, dilation=1, groups=1, bias) -> ReLU.

    x_nchw      : (N, Cin, H, W)
    weight_oihw : (Cout, Cin, KH, KW)
    bias        : (Cout,)
    returns     : (N, Cout, Ho, Wo)   (NCHW, matching PyTorch)
    """
    N, Cin, H, W = x_nchw.shape
    Cout, Cin_w, KH, KW = weight_oihw.shape
    assert Cin == Cin_w
    out_dtype = x_nchw.dtype
    Ho = H + 2 * padding - KH + 1
    Wo = W + 2 * padding - KW + 1
    assert Ho >= 1 and Wo >= 1

    # --- generation-aware defaults (v5e: 128-wide MXU, lower HBM BW) --------
    try:
        kind = jax.devices()[0].device_kind.lower()
    except Exception:
        kind = ""
    is_v5e = ("v5 lite" in kind) or ("v5e" in kind) or ("v5litepod" in kind)

    if block_m is None:
        block_m = 256 if is_v5e else 512           # target MXU M = TH * Wo

    # --- row tiling: TH output rows per tile; pad Ho so TH divides it -------
    th_align = 8 // math.gcd(Wo, 8)                # keep TH*Wo a sublane multiple
    TH = max(1, block_m // max(Wo, 1))
    TH = max(th_align, (TH // th_align) * th_align)
    TH = min(TH, _round_up(Ho, th_align))
    Ho_pad = _round_up(Ho, TH)
    HT = Ho_pad // TH
    NB = -(-(TH + KH - 1) // TH)                   # input row blocks per tile

    # --- channel padding / tiling --------------------------------------------
    CPAD = _round_up(Cin, 128)                     # lane-aligned tap slots
    Cout_pad = _round_up(Cout, 128) if pad_cout_lanes else Cout
    if block_c is not None:
        TC = block_c
    elif Cout_pad % 256 == 0 and not is_v5e:
        TC = 256                                   # full 256-wide MXU N (v6e/v7x)
    elif Cout_pad % 128 == 0:
        TC = 128                                   # v5e native width / more col reuse
    else:
        TC = Cout_pad                              # tiny unpadded Cout: one tile
    assert Cout_pad % TC == 0
    CT = Cout_pad // TC

    # --- glue: NCHW -> NHWC, cast, zero halo + bottom block padding ----------
    # TODO(synk): keep NHWC end-to-end in a fused pipeline and fetch the halo
    #             with in-kernel DMA instead of this padded HBM copy.
    x = jnp.transpose(x_nchw, (0, 2, 3, 1)).astype(compute_dtype)    # NHWC
    Wp = W + 2 * padding
    Hp_total = (HT + NB - 1) * TH                  # rows incl. halo + block pad
    bottom = Hp_total - H - padding
    x = jnp.pad(x, ((0, 0), (padding, bottom), (padding, padding), (0, 0)))

    # Weight -> (KH*KW*CPAD, Cout_pad); padded rows/cols are zero, so exact.
    w_hwio = jnp.transpose(weight_oihw, (2, 3, 1, 0))                # (KH,KW,Cin,Cout)
    w_pad = jnp.zeros((KH, KW, CPAD, Cout_pad), compute_dtype)
    w_pad = w_pad.at[:, :, :Cin, :Cout].set(w_hwio.astype(compute_dtype))
    w_flat = w_pad.reshape(KH * KW * CPAD, Cout_pad)
    b_pad = jnp.zeros((1, Cout_pad), jnp.float32).at[0, :Cout].set(
        bias.astype(jnp.float32))

    # --- VMEM budget (cap below v7x's 64 MiB/TC physical limit) --------------
    cb = jnp.dtype(compute_dtype).itemsize
    ob = jnp.dtype(out_dtype).itemsize
    est = (NB * 2 * TH * Wp * Cin * cb             # input row blocks (x2 buffers)
           + 2 * (KH * KW * CPAD) * Cout_pad * cb  # resident weight
           + 2 * Cout_pad * 4                      # resident bias
           + 2 * TH * Wo * TC * ob                 # output tiles (x2 buffers)
           + TH * Wo * KH * KW * CPAD * cb)        # im2col scratch
    vmem_limit = int(min(max(int(est * 1.5) + (8 << 20), 24 << 20), 48 << 20))

    kernel = functools.partial(
        _conv_relu_kernel, NB=NB, KH=KH, KW=KW, TH=TH, Wo=Wo,
        Cin=Cin, CPAD=CPAD, TC=TC, CT=CT)

    in_specs = [
        pl.BlockSpec((None, TH, Wp, Cin),
                     lambda n, ht, ct, j=j: (n, ht + j, 0, 0))
        for j in range(NB)
    ]
    in_specs += [
        pl.BlockSpec((KH * KW * CPAD, Cout_pad), lambda n, ht, ct: (0, 0)),
        pl.BlockSpec((1, Cout_pad), lambda n, ht, ct: (0, 0)),
    ]

    out_flat = pl.pallas_call(
        kernel,
        out_shape=jax.ShapeDtypeStruct((N, Ho_pad * Wo, Cout_pad), out_dtype),
        grid_spec=pltpu.PrefetchScalarGridSpec(
            num_scalar_prefetch=0,
            grid=(N, HT, CT),
            in_specs=in_specs,
            out_specs=pl.BlockSpec((None, TH * Wo, TC),
                                   lambda n, ht, ct: (n, ht, ct)),
            scratch_shapes=[
                pltpu.VMEM((TH * Wo, KH * KW * CPAD), compute_dtype),
            ],
        ),
        compiler_params=pltpu.CompilerParams(
            dimension_semantics=("parallel", "parallel", "arbitrary"),
            vmem_limit_bytes=vmem_limit,
        ),
    )(*([x] * NB), w_flat, b_pad)

    out = out_flat.reshape(N, Ho_pad, Wo, Cout_pad)[:, :Ho, :, :Cout]
    return jnp.transpose(out, (0, 3, 1, 2))                          # NCHW


def _reference(x_nchw, weight_oihw, bias, padding=1):
    out = jax.lax.conv_general_dilated(
        x_nchw, weight_oihw,
        window_strides=(1, 1),
        padding=[(padding, padding), (padding, padding)],
        dimension_numbers=("NCHW", "OIHW", "NCHW"))
    out = out + bias[None, :, None, None]
    return jnp.maximum(out, 0.0)


if __name__ == "__main__":
    key = jax.random.PRNGKey(0)

    def make_case(k, N, Cin, H, W, Cout, KH=3, KW=3):
        kx, kw_, kb = jax.random.split(k, 3)
        x = jax.random.normal(kx, (N, Cin, H, W), dtype=jnp.float32)
        fan_in = Cin * KH * KW
        w = jax.random.normal(kw_, (Cout, Cin, KH, KW), dtype=jnp.float32) \
            * (2.0 / fan_in) ** 0.5
        b = jax.random.normal(kb, (Cout,), dtype=jnp.float32) * 0.01
        return x, w, b

    k1, k2, k3 = jax.random.split(key, 3)

    # Case 1: f32 parity path, multiple row tiles (HT > 1) exercising the
    #         cross-block halo reads.
    x, w, b = make_case(k1, 2, 4, 16, 16, 8)
    out = jax.block_until_ready(
        conv_module_forward(x, w, b, padding=1,
                            compute_dtype=jnp.float32, block_m=64))
    ref = jax.block_until_ready(_reference(x, w, b, padding=1))
    np.testing.assert_allclose(np.asarray(out), np.asarray(ref),
                               rtol=1e-4, atol=1e-4)

    # Case 2: default bf16 MXU path (f32 accumulate) on the same inputs.
    out_bf16 = jax.block_until_ready(conv_module_forward(x, w, b, padding=1))
    np.testing.assert_allclose(np.asarray(out_bf16), np.asarray(ref),
                               rtol=5e-2, atol=5e-2)

    # Case 3: multiple Cout tiles (CT > 1): resident weight sliced in-kernel
    #         with pl.ds, im2col scratch reused across the ct axis.
    x3, w3, b3 = make_case(k3, 1, 8, 8, 8, 256)
    out3 = jax.block_until_ready(
        conv_module_forward(x3, w3, b3, padding=1,
                            compute_dtype=jnp.float32, block_c=128))
    ref3 = jax.block_until_ready(_reference(x3, w3, b3, padding=1))
    np.testing.assert_allclose(np.asarray(out3), np.asarray(ref3),
                               rtol=1e-4, atol=1e-4)

    # TODO(synk): with_explicit_padding ('reflect'), spectral_norm, groups>1,
    # stride>1 and dilation>1 are not part of the default DPT-head ConvModule
    # config and are not implemented here.
    print("KERNEL_OK")
</pallas_src>

<mosaic_0001>
module attributes {stable_mosaic.version = 11 : i64} {
  func.func @_conv_relu_kernel(%arg0: i32, %arg1: i32, %arg2: i32, %arg3: memref<1x4x18x4xf32, #tpu.memory_space<vmem>>, %arg4: memref<1x4x18x4xf32, #tpu.memory_space<vmem>>, %arg5: memref<1152x128xf32, #tpu.memory_space<vmem>>, %arg6: memref<1x128xf32, #tpu.memory_space<vmem>>, %arg7: memref<1x64x128xf32, #tpu.memory_space<vmem>>, %arg8: memref<64x1152xf32, #tpu.memory_space<vmem>>) attributes {dimension_semantics = [#tpu.dimension_semantics<parallel>, #tpu.dimension_semantics<parallel>, #tpu.dimension_semantics<arbitrary>], iteration_bounds = array<i64: 2, 4, 1>, scalar_prefetch = 0 : i64, scratch_operands = 1 : i64, tpu.core_type = #tpu.core_type<tc>, window_params = [{transform_indices = @transform_0, window_bounds = array<i64: 1, 4, 18, 4>}, {transform_indices = @transform_1, window_bounds = array<i64: 1, 4, 18, 4>}, {pipeline_mode = #tpu.pipeline_mode<synchronous>, transform_indices = @transform_2, window_bounds = array<i64: 1152, 128>}, {pipeline_mode = #tpu.pipeline_mode<synchronous>, transform_indices = @transform_3, window_bounds = array<i64: 1, 128>}, {transform_indices = @transform_4, window_bounds = array<i64: 1, 64, 128>}]} {
    %c0_i32 = arith.constant 0 : i32
    %0 = arith.cmpi eq, %arg2, %c0_i32 : i32
    %1 = arith.extui %0 : i1 to i32
    %c0_i32_0 = arith.constant 0 : i32
    %2 = arith.cmpi ne, %1, %c0_i32_0 : i32
    scf.if %2 {
      %cst_10 = arith.constant 0.000000e+00 : f32
      %14 = vector.broadcast %cst_10 : f32 to vector<64x124xf32>
      %c0_11 = arith.constant 0 : index
      %c4 = arith.constant 4 : index
      %15 = vector.load %arg8[%c0_11, %c4] : memref<64x1152xf32, #tpu.memory_space<vmem>>, vector<64x124xf32>
      tpu.vector_store %arg8[%c0_11, %c4], %14 {strides = array<i32>} : memref<64x1152xf32, #tpu.memory_space<vmem>>, vector<64x124xf32>,
      %c0_12 = arith.constant 0 : index
      %c132 = arith.constant 132 : index
      %16 = vector.load %arg8[%c0_12, %c132] : memref<64x1152xf32, #tpu.memory_space<vmem>>, vector<64x124xf32>
      tpu.vector_store %arg8[%c0_12, %c132], %14 {strides = array<i32>} : memref<64x1152xf32, #tpu.memory_space<vmem>>, vector<64x124xf32>,
      %c0_13 = arith.constant 0 : index
      %c260 = arith.constant 260 : index
      %17 = vector.load %arg8[%c0_13, %c260] : memref<64x1152xf32, #tpu.memory_space<vmem>>, vector<64x124xf32>
      tpu.vector_store %arg8[%c0_13, %c260], %14 {strides = array<i32>} : memref<64x1152xf32, #tpu.memory_space<vmem>>, vector<64x124xf32>,
      %c0_14 = arith.constant 0 : index
      %c388 = arith.constant 388 : index
      %18 = vector.load %arg8[%c0_14, %c388] : memref<64x1152xf32, #tpu.memory_space<vmem>>, vector<64x124xf32>
      tpu.vector_store %arg8[%c0_14, %c388], %14 {strides = array<i32>} : memref<64x1152xf32, #tpu.memory_space<vmem>>, vector<64x124xf32>,
      %c0_15 = arith.constant 0 : index
      %c516 = arith.constant 516 : index
      %19 = vector.load %arg8[%c0_15, %c516] : memref<64x1152xf32, #tpu.memory_space<vmem>>, vector<64x124xf32>
      tpu.vector_store %arg8[%c0_15, %c516], %14 {strides = array<i32>} : memref<64x1152xf32, #tpu.memory_space<vmem>>, vector<64x124xf32>,
      %c0_16 = arith.constant 0 : index
      %c644 = arith.constant 644 : index
      %20 = vector.load %arg8[%c0_16, %c644] : memref<64x1152xf32, #tpu.memory_space<vmem>>, vector<64x124xf32>
      tpu.vector_store %arg8[%c0_16, %c644], %14 {strides = array<i32>} : memref<64x1152xf32, #tpu.memory_space<vmem>>, vector<64x124xf32>,
      %c0_17 = arith.constant 0 : index
      %c772 = arith.constant 772 : index
      %21 = vector.load %arg8[%c0_17, %c772] : memref<64x1152xf32, #tpu.memory_space<vmem>>, vector<64x124xf32>
      tpu.vector_store %arg8[%c0_17, %c772], %14 {strides = array<i32>} : memref<64x1152xf32, #tpu.memory_space<vmem>>, vector<64x124xf32>,
      %c0_18 = arith.constant 0 : index
      %c900 = arith.constant 900 : index
      %22 = vector.load %arg8[%c0_18, %c900] : memref<64x1152xf32, #tpu.memory_space<vmem>>, vector<64x124xf32>
      tpu.vector_store %arg8[%c0_18, %c900], %14 {strides = array<i32>} : memref<64x1152xf32, #tpu.memory_space<vmem>>, vector<64x124xf32>,
      %c0_19 = arith.constant 0 : index
      %c1028 = arith.constant 1028 : index
      %23 = vector.load %arg8[%c0_19, %c1028] : memref<64x1152xf32, #tpu.memory_space<vmem>>, vector<64x124xf32>
      tpu.vector_store %arg8[%c0_19, %c1028], %14 {strides = array<i32>} : memref<64x1152xf32, #tpu.memory_space<vmem>>, vector<64x124xf32>,
      %c0_20 = arith.constant 0 : index
      %c0_21 = arith.constant 0 : index
      %c0_22 = arith.constant 0 : index
      %c0_23 = arith.constant 0 : index
      %24 = vector.load %arg3[%c0_20, %c0_21, %c0_22, %c0_23] : memref<1x4x18x4xf32, #tpu.memory_space<vmem>>, vector<1x4x18x4xf32>
      %25 = vector.shape_cast %24 : vector<1x4x18x4xf32> to vector<4x18x4xf32>
      %26 = vector.extract_strided_slice %25 {offsets = [0, 0, 0], sizes = [4, 16, 4], strides = [1, 1, 1]} : vector<4x18x4xf32> to vector<4x16x4xf32>
      %27 = vector.shape_cast %26 : vector<4x16x4xf32> to vector<64x4xf32>
      %c0_24 = arith.constant 0 : index
      %c0_25 = arith.constant 0 : index
      %28 = vector.load %arg8[%c0_24, %c0_25] : memref<64x1152xf32, #tpu.memory_space<vmem>>, vector<64x4xf32>
      tpu.vector_store %arg8[%c0_24, %c0_25], %27 {strides = array<i32>} : memref<64x1152xf32, #tpu.memory_space<vmem>>, vector<64x4xf32>,
      %29 = vector.extract_strided_slice %25 {offsets = [0, 1, 0], sizes = [4, 16, 4], strides = [1, 1, 1]} : vector<4x18x4xf32> to vector<4x16x4xf32>
      %30 = vector.shape_cast %29 : vector<4x16x4xf32> to vector<64x4xf32>
      %c0_26 = arith.constant 0 : index
      %c128 = arith.constant 128 : index
      %31 = vector.load %arg8[%c0_26, %c128] : memref<64x1152xf32, #tpu.memory_space<vmem>>, vector<64x4xf32>
      tpu.vector_store %arg8[%c0_26, %c128], %30 {strides = array<i32>} : memref<64x1152xf32, #tpu.memory_space<vmem>>, vector<64x4xf32>,
      %32 = vector.extract_strided_slice %25 {offsets = [0, 2, 0], sizes = [4, 16, 4], strides = [1, 1, 1]} : vector<4x18x4xf32> to vector<4x16x4xf32>
      %33 = vector.shape_cast %32 : vector<4x16x4xf32> to vector<64x4xf32>
      %c0_27 = arith.constant 0 : index
      %c256 = arith.constant 256 : index
      %34 = vector.load %arg8[%c0_27, %c256] : memref<64x1152xf32, #tpu.memory_space<vmem>>, vector<64x4xf32>
      tpu.vector_store %arg8[%c0_27, %c256], %33 {strides = array<i32>} : memref<64x1152xf32, #tpu.memory_space<vmem>>, vector<64x4xf32>,
      %c0_28 = arith.constant 0 : index
      %c1 = arith.constant 1 : index
      %c0_29 = arith.constant 0 : index
      %c0_30 = arith.constant 0 : index
      %35 = vector.load %arg3[%c0_28, %c1, %c0_29, %c0_30] : memref<1x4x18x4xf32, #tpu.memory_space<vmem>>, vector<1x3x18x4xf32>
      %36 = vector.shape_cast %35 : vector<1x3x18x4xf32> to vector<3x18x4xf32>
      %37 = vector.extract_strided_slice %36 {offsets = [0, 0, 0], sizes = [3, 16, 4], strides = [1, 1, 1]} : vector<3x18x4xf32> to vector<3x16x4xf32>
      %38 = vector.shape_cast %37 : vector<3x16x4xf32> to vector<48x4xf32>
      %c0_31 = arith.constant 0 : index
      %c384 = arith.constant 384 : index
      %39 = vector.load %arg8[%c0_31, %c384] : memref<64x1152xf32, #tpu.memory_space<vmem>>, vector<48x4xf32>
      tpu.vector_store %arg8[%c0_31, %c384], %38 {strides = array<i32>} : memref<64x1152xf32, #tpu.memory_space<vmem>>, vector<48x4xf32>,
      %40 = vector.extract_strided_slice %36 {offsets = [0, 1, 0], sizes = [3, 16, 4], strides = [1, 1, 1]} : vector<3x18x4xf32> to vector<3x16x4xf32>
      %41 = vector.shape_cast %40 : vector<3x16x4xf32> to vector<48x4xf32>
      %c0_32 = arith.constant 0 : index
      %c512 = arith.constant 512 : index
      %42 = vector.load %arg8[%c0_32, %c512] : memref<64x1152xf32, #tpu.memory_space<vmem>>, vector<48x4xf32>
      tpu.vector_store %arg8[%c0_32, %c512], %41 {strides = array<i32>} : memref<64x1152xf32, #tpu.memory_space<vmem>>, vector<48x4xf32>,
      %43 = vector.extract_strided_slice %36 {offsets = [0, 2, 0], sizes = [3, 16, 4], strides = [1, 1, 1]} : vector<3x18x4xf32> to vector<3x16x4xf32>
      %44 = vector.shape_cast %43 : vector<3x16x4xf32> to vector<48x4xf32>
      %c0_33 = arith.constant 0 : index
      %c640 = arith.constant 640 : index
      %45 = vector.load %arg8[%c0_33, %c640] : memref<64x1152xf32, #tpu.memory_space<vmem>>, vector<48x4xf32>
      tpu.vector_store %arg8[%c0_33, %c640], %44 {strides = array<i32>} : memref<64x1152xf32, #tpu.memory_space<vmem>>, vector<48x4xf32>,
      %c0_34 = arith.constant 0 : index
      %c0_35 = arith.constant 0 : index
      %c0_36 = arith.constant 0 : index
      %c0_37 = arith.constant 0 : index
      %46 = vector.load %arg4[%c0_34, %c0_35, %c0_36, %c0_37] : memref<1x4x18x4xf32, #tpu.memory_space<vmem>>, vector<1x1x18x4xf32>
      %47 = vector.shape_cast %46 : vector<1x1x18x4xf32> to vector<1x18x4xf32>
      %48 = vector.extract_strided_slice %47 {offsets = [0, 0, 0], sizes = [1, 16, 4], strides = [1, 1, 1]} : vector<1x18x4xf32> to vector<1x16x4xf32>
      %49 = vector.shape_cast %48 : vector<1x16x4xf32> to vector<16x4xf32>
      %c48 = arith.constant 48 : index
      %c384_38 = arith.constant 384 : index
      %50 = vector.load %arg8[%c48, %c384_38] : memref<64x1152xf32, #tpu.memory_space<vmem>>, vector<16x4xf32>
      tpu.vector_store %arg8[%c48, %c384_38], %49 {strides = array<i32>} : memref<64x1152xf32, #tpu.memory_space<vmem>>, vector<16x4xf32>,
      %51 = vector.extract_strided_slice %47 {offsets = [0, 1, 0], sizes = [1, 16, 4], strides = [1, 1, 1]} : vector<1x18x4xf32> to vector<1x16x4xf32>
      %52 = vector.shape_cast %51 : vector<1x16x4xf32> to vector<16x4xf32>
      %c48_39 = arith.constant 48 : index
      %c512_40 = arith.constant 512 : index
      %53 = vector.load %arg8[%c48_39, %c512_40] : memref<64x1152xf32, #tpu.memory_space<vmem>>, vector<16x4xf32>
      tpu.vector_store %arg8[%c48_39, %c512_40], %52 {strides = array<i32>} : memref<64x1152xf32, #tpu.memory_space<vmem>>, vector<16x4xf32>,
      %54 = vector.extract_strided_slice %47 {offsets = [0, 2, 0], sizes = [1, 16, 4], strides = [1, 1, 1]} : vector<1x18x4xf32> to vector<1x16x4xf32>
      %55 = vector.shape_cast %54 : vector<1x16x4xf32> to vector<16x4xf32>
      %c48_41 = arith.constant 48 : index
      %c640_42 = arith.constant 640 : index
      %56 = vector.load %arg8[%c48_41, %c640_42] : memref<64x1152xf32, #tpu.memory_space<vmem>>, vector<16x4xf32>
      tpu.vector_store %arg8[%c48_41, %c640_42], %55 {strides = array<i32>} : memref<64x1152xf32, #tpu.memory_space<vmem>>, vector<16x4xf32>,
      %c0_43 = arith.constant 0 : index
      %c2 = arith.constant 2 : index
      %c0_44 = arith.constant 0 : index
      %c0_45 = arith.constant 0 : index
      %57 = vector.load %arg3[%c0_43, %c2, %c0_44, %c0_45] : memref<1x4x18x4xf32, #tpu.memory_space<vmem>>, vector<1x2x18x4xf32>
      %58 = vector.shape_cast %57 : vector<1x2x18x4xf32> to vector<2x18x4xf32>
      %59 = vector.extract_strided_slice %58 {offsets = [0, 0, 0], sizes = [2, 16, 4], strides = [1, 1, 1]} : vector<2x18x4xf32> to vector<2x16x4xf32>
      %60 = vector.shape_cast %59 : vector<2x16x4xf32> to vector<32x4xf32>
      %c0_46 = arith.constant 0 : index
      %c768 = arith.constant 768 : index
      %61 = vector.load %arg8[%c0_46, %c768] : memref<64x1152xf32, #tpu.memory_space<vmem>>, vector<32x4xf32>
      tpu.vector_store %arg8[%c0_46, %c768], %60 {strides = array<i32>} : memref<64x1152xf32, #tpu.memory_space<vmem>>, vector<32x4xf32>,
      %62 = vector.extract_strided_slice %58 {offsets = [0, 1, 0], sizes = [2, 16, 4], strides = [1, 1, 1]} : vector<2x18x4xf32> to vector<2x16x4xf32>
      %63 = vector.shape_cast %62 : vector<2x16x4xf32> to vector<32x4xf32>
      %c0_47 = arith.constant 0 : index
      %c896 = arith.constant 896 : index
      %64 = vector.load %arg8[%c0_47, %c896] : memref<64x1152xf32, #tpu.memory_space<vmem>>, vector<32x4xf32>
      tpu.vector_store %arg8[%c0_47, %c896], %63 {strides = array<i32>} : memref<64x1152xf32, #tpu.memory_space<vmem>>, vector<32x4xf32>,
      %65 = vector.extract_strided_slice %58 {offsets = [0, 2, 0], sizes = [2, 16, 4], strides = [1, 1, 1]} : vector<2x18x4xf32> to vector<2x16x4xf32>
      %66 = vector.shape_cast %65 : vector<2x16x4xf32> to vector<32x4xf32>
      %c0_48 = arith.constant 0 : index
      %c1024 = arith.constant 1024 : index
      %67 = vector.load %arg8[%c0_48, %c1024] : memref<64x1152xf32, #tpu.memory_space<vmem>>, vector<32x4xf32>
      tpu.vector_store %arg8[%c0_48, %c1024], %66 {strides = array<i32>} : memref<64x1152xf32, #tpu.memory_space<vmem>>, vector<32x4xf32>,
      %c0_49 = arith.constant 0 : index
      %c0_50 = arith.constant 0 : index
      %c0_51 = arith.constant 0 : index
      %c0_52 = arith.constant 0 : index
      %68 = vector.load %arg4[%c0_49, %c0_50, %c0_51, %c0_52] : memref<1x4x18x4xf32, #tpu.memory_space<vmem>>, vector<1x2x18x4xf32>
      %69 = vector.shape_cast %68 : vector<1x2x18x4xf32> to vector<2x18x4xf32>
      %70 = vector.extract_strided_slice %69 {offsets = [0, 0, 0], sizes = [2, 16, 4], strides = [1, 1, 1]} : vector<2x18x4xf32> to vector<2x16x4xf32>
      %71 = vector.shape_cast %70 : vector<2x16x4xf32> to vector<32x4xf32>
      %c32 = arith.constant 32 : index
      %c768_53 = arith.constant 768 : index
      %72 = vector.load %arg8[%c32, %c768_53] : memref<64x1152xf32, #tpu.memory_space<vmem>>, vector<32x4xf32>
      tpu.vector_store %arg8[%c32, %c768_53], %71 {strides = array<i32>} : memref<64x1152xf32, #tpu.memory_space<vmem>>, vector<32x4xf32>,
      %73 = vector.extract_strided_slice %69 {offsets = [0, 1, 0], sizes = [2, 16, 4], strides = [1, 1, 1]} : vector<2x18x4xf32> to vector<2x16x4xf32>
      %74 = vector.shape_cast %73 : vector<2x16x4xf32> to vector<32x4xf32>
      %c32_54 = arith.constant 32 : index
      %c896_55 = arith.constant 896 : index
      %75 = vector.load %arg8[%c32_54, %c896_55] : memref<64x1152xf32, #tpu.memory_space<vmem>>, vector<32x4xf32>
      tpu.vector_store %arg8[%c32_54, %c896_55], %74 {strides = array<i32>} : memref<64x1152xf32, #tpu.memory_space<vmem>>, vector<32x4xf32>,
      %76 = vector.extract_strided_slice %69 {offsets = [0, 2, 0], sizes = [2, 16, 4], strides = [1, 1, 1]} : vector<2x18x4xf32> to vector<2x16x4xf32>
      %77 = vector.shape_cast %76 : vector<2x16x4xf32> to vector<32x4xf32>
      %c32_56 = arith.constant 32 : index
      %c1024_57 = arith.constant 1024 : index
      %78 = vector.load %arg8[%c32_56, %c1024_57] : memref<64x1152xf32, #tpu.memory_space<vmem>>, vector<32x4xf32>
      tpu.vector_store %arg8[%c32_56, %c1024_57], %77 {strides = array<i32>} : memref<64x1152xf32, #tpu.memory_space<vmem>>, vector<32x4xf32>,
    } else {
    }
    %c0 = arith.constant 0 : index
    %c0_1 = arith.constant 0 : index
    %3 = vector.load %arg5[%c0, %c0_1] : memref<1152x128xf32, #tpu.memory_space<vmem>>, vector<1152x128xf32>
    %c0_2 = arith.constant 0 : index
    %c0_3 = arith.constant 0 : index
    %4 = vector.load %arg6[%c0_2, %c0_3] : memref<1x128xf32, #tpu.memory_space<vmem>>, vector<1x128xf32>
    %c0_4 = arith.constant 0 : index
    %c0_5 = arith.constant 0 : index
    %5 = vector.load %arg8[%c0_4, %c0_5] : memref<64x1152xf32, #tpu.memory_space<vmem>>, vector<64x1152xf32>
    %cst = arith.constant dense<0.000000e+00> : vector<64x128xf32>
    %6 = tpu.matmul %5, %3, %cst {dimension_numbers = #tpu.dot_dimension_numbers<[1], [0], [0], [1], [0, 0, 1, 1], [], []>} : vector<64x1152xf32>, vector<1152x128xf32>, vector<64x128xf32> -> vector<64x128xf32>
    %7 = vector.broadcast %4 : vector<1x128xf32> to vector<64x128xf32>
    %8 = arith.addf %6, %7 : vector<64x128xf32>
    %cst_6 = arith.constant 0.000000e+00 : f32
    %9 = vector.broadcast %cst_6 : f32 to vector<64x128xf32>
    %10 = arith.maximumf %8, %9 : vector<64x128xf32>
    %c0_7 = arith.constant 0 : index
    %c0_8 = arith.constant 0 : index
    %c0_9 = arith.constant 0 : index
    %11 = vector.load %arg7[%c0_7, %c0_8, %c0_9] : memref<1x64x128xf32, #tpu.memory_space<vmem>>, vector<1x64x128xf32>
    %12 = vector.shape_cast %11 : vector<1x64x128xf32> to vector<64x128xf32>
    %13 = vector.shape_cast %10 : vector<64x128xf32> to vector<1x64x128xf32>
    tpu.vector_store %arg7[%c0_7, %c0_8, %c0_9], %13 {strides = array<i32>} : memref<1x64x128xf32, #tpu.memory_space<vmem>>, vector<1x64x128xf32>,
    return
  }
  func.func @transform_0(%arg0: i32, %arg1: i32, %arg2: i32) -> (i32, i32, i32, i32) {
    %c0_i32 = arith.constant 0 : i32
    %0 = arith.addi %arg1, %c0_i32 : i32
    %c0_i32_0 = arith.constant 0 : i32
    %c0_i32_1 = arith.constant 0 : i32
    %c0_i32_2 = arith.constant 0 : i32
    return %arg0, %0, %c0_i32_0, %c0_i32_1 : i32, i32, i32, i32
  }
  func.func @transform_1(%arg0: i32, %arg1: i32, %arg2: i32) -> (i32, i32, i32, i32) {
    %c1_i32 = arith.constant 1 : i32
    %0 = arith.addi %arg1, %c1_i32 : i32
    %c0_i32 = arith.constant 0 : i32
    %c0_i32_0 = arith.constant 0 : i32
    %c0_i32_1 = arith.constant 0 : i32
    return %arg0, %0, %c0_i32, %c0_i32_0 : i32, i32, i32, i32
  }
  func.func @transform_2(%arg0: i32, %arg1: i32, %arg2: i32) -> (i32, i32) {
    %c0_i32 = arith.constant 0 : i32
    %c0_i32_0 = arith.constant 0 : i32
    %c0_i32_1 = arith.constant 0 : i32
    return %c0_i32, %c0_i32_0 : i32, i32
  }
  func.func @transform_3(%arg0: i32, %arg1: i32, %arg2: i32) -> (i32, i32) {
    %c0_i32 = arith.constant 0 : i32
    %c0_i32_0 = arith.constant 0 : i32
    %c0_i32_1 = arith.constant 0 : i32
    return %c0_i32, %c0_i32_0 : i32, i32
  }
  func.func @transform_4(%arg0: i32, %arg1: i32, %arg2: i32) -> (i32, i32, i32) {
    %c0_i32 = arith.constant 0 : i32
    return %arg0, %arg1, %arg2 : i32, i32, i32
  }
}

</mosaic_0001>

<bundles_post_ra>
// kernel: tpu_custom_call.1
= control target key start
LH: loop header
LB: loop body
LE: loop exit
PB: predicated region body
PF: predicated region fallthrough
CT: control target
= control target key end

     0   :  { %9 = vsyncpa [#allocation4], 0  ;;  %s3428_s0 = inlined_call_operand.vmem [shape: f32[2,20,18,4], index: 0, kind: input, shape index: {}]   ;;  %s3429_s1 = inlined_call_operand.vmem [shape: f32[2,20,18,4], index: 1, kind: input, shape index: {}]   ;;  %s3430_s2 = inlined_call_operand.vmem [shape: f32[1152,128], index: 2, kind: input, shape index: {}]   ;;  %s3431_s3 = inlined_call_operand.vmem [shape: f32[1,128], index: 3, kind: input, shape index: {}]   ;;  %s3432_s4 = inlined_call_operand.hbm [shape: f32[2,256,128], index: 4, kind: output, shape index: {}]  }
   0x1   :  { %11 = vsyncpa [#allocation4 + $0x1], 0  ;;  %s2274_s15 = smov 0   ;;  %s2276_s16 = smov 0  }
   0x2   :  { %s2278_s17 = smov 0   ;;  %s2280_s18 = smov 0  }
   0x3   :  { %s2282_s19 = smov 0   ;;  %s2284_s20 = smov 0  }
   0x4   :  { %s2286_s21 = smov 0   ;;  %s2288_s22 = smov 0  }
   0x5 LB: > { %s1570_s23 = sadd.s32 4294967295, %s2243_s22   ;;  %s1571_s24 = sadd.s32 4294967294, %s2243_s22   ;;  %s2243_s22 = sphi %s2288_s22, %s17_s22   ;;  %s2239_s21 = sphi %s2286_s21, %s3450_s21   ;;  %s2235_s20 = sphi %s2284_s20, %s3449_s20   ;;  %s2231_s19 = sphi %s2282_s19, %s3448_s19   ;;  %s2227_s18 = sphi %s2280_s18, %s3447_s18   ;;  %s2223_s17 = sphi %s2278_s17, %s3446_s17   ;;  %s2219_s16 = sphi %s2276_s16, %s3445_s16   ;;  %s2215_s15 = sphi %s2274_s15, %s3444_s15  }
   0x6   : > { %s32_s25 = sadd.s32 1, %s2235_s20  ;;  %s36_s26 = sadd.s32 1, %s2239_s21 }
   0x7   : > { %p34_p0 = scmp.ge.s32.totalorder %s32_s25, 4  ;;  %p157_p1 = scmp.ne.s32.totalorder %s2223_s17, %s2219_s16 }
   0x8   : > { %p158_p2 = scmp.eq.s32.totalorder %s1570_s23, 7  ;;  %p163_p5 = scmp.ne.s32.totalorder %s2219_s16, %s2215_s15 }
   0x9   : > { %s3452_s25 = smov (%p34_p0, %s32_s25), 0  ;;  %s3454_s26 = smov (!%p34_p0, %s36_s26), %s2239_s21 }
   0xa   : > { %3435 = sst [smem:[#allocation6_spill]] %s3452_s25  ;;  %s141_s27 = ssub.s32 %s2235_s20, %s3452_s25 }
   0xb   : > { %p2325_p3 = por %p158_p2, %p157_p1  ;;  %p38_p4 = scmp.ge.s32.totalorder %s3454_s26, 2 }
   0xc   : > { %p164_p6 = scmp.eq.s32.totalorder %s1571_s24, 7  ;;  %p1574_p7 = scmp.ge.s32.totalorder %s2243_s22, 1 }
   0xd   : > { %s3456_s26 = smov (%p38_p4, %s3454_s26), 0  ;;  %p218_p9 = scmp.lt.s32.totalorder %s2243_s22, 9 }
   0xe   : > { %3437 = sst [smem:[#allocation7_spill]] %s3456_s26  ;;  %p2334_p8 = por %p164_p6, %p163_p5 }
   0xf   : > { %s140_s30 = ssub.s32 %s2239_s21, %s3456_s26  ;;  %s147_s5 = sadd.s32 1, %s2223_s17 }
  0x10   : > { %s142_s6 = sor.u32 %s141_s27, %s140_s30  ;;  %p219_p10 = pnand %p1574_p7, %p218_p9 }
  0x11   : > { %p145_p11 = scmp.eq.s32.totalorder %s142_s6, 0  ;;  %v2348_v0 = vld [vmem:[%s3430_s2 + $0x80] sm:$0xff] (!%p219_p10)  ;;  %v2353_v1 = vld [vmem:[%s3430_s2 + $0x88] sm:$0xff] (!%p219_p10)  ;;  %s2361_s14 = sshll.u32 (!%p219_p10), %s2227_s18, 2  ;;  %vm289_vm0 = vcmask (!%p219_p10), 1047584   ;;  %v2399_v11 = vld [vmem:[%s3430_s2 + $0x90] sm:$0xff] (!%p219_p10) }
  0x12   : > { %222 = sbr.rel (%p219_p10) target bundleno = 371 (0x173), region = 36  ;;  %v2358_v2 = vld [vmem:[%s3430_s2 + $0x180] sm:$0xff] (!%p219_p10)  ;;  %p261_p12 = scmp.lt.s32.totalorder (!%p219_p10), %s2231_s19, 1  ;;  %v1896_v3 = vpack.c.bf16 (!%p219_p10), %v2353_v1, %v2348_v0  ;;  %v2369_v4 = vld [vmem:[%s3430_s2 + $0x188] sm:$0xff] (!%p219_p10)  ;;  %v2245_v12 = vmov (!%p219_p10), 0.0   ;;  %v698_v14 = vld [vmem:[%s3430_s2 + $0x98] sm:$0xff] (!%p219_p10) }
  0x13   : > { %s2343_s7 = scalar_select %p145_p11, %s2223_s17, %s147_s5  }
  0x14   : > { %v2374_v5 = vld [vmem:[%s3430_s2] sm:$0xff] (!%p219_p10)  ;;  %v2379_v6 = vld [vmem:[%s3430_s2 + $0x8] sm:$0xff] (!%p219_p10)  ;;  %p263_p13 = scmp.lt.s32.totalorder (!%p219_p10), %s2361_s14, 19  ;;  %v1928_v7 = vpack.c.bf16 (!%p219_p10), %v2369_v4, %v2358_v2  ;;  %298 = vst.msk [vmem:[#allocation2 + $0x8] sm:$0xff] (!%p219_p10), %vm289_vm0, %v2245_v12  ;;  %290 = vst.msk [vmem:[#allocation2] sm:$0xff] (!%p219_p10), %vm289_vm0, %v2245_v12  ;;  %1897 = vmatprep.subr.bf16.mxu0 (!%p219_p10), %v1896_v3  ;;  %v1900_v17 = vpack.c.bf16 (!%p219_p10), %v698_v14, %v2399_v11  ;;  %vm374_vm1 = vcmask (!%p219_p10), 31744  }
  0x15   : > { %v1898_v8 = vpack.c.bf16 (!%p219_p10), %v2379_v6, %v2374_v5  ;;  %v2389_v9 = vld [vmem:[%s3430_s2 + $0x100] sm:$0xff] (!%p219_p10)  ;;  %v2394_v10 = vld [vmem:[%s3430_s2 + $0x108] sm:$0xff] (!%p219_p10)  ;;  %291 = vst.msk [vmem:[#allocation2 + $0x48] sm:$0xff] (!%p219_p10), %vm289_vm0, %v2245_v12  ;;  %292 = vst.msk [vmem:[#allocation2 + $0x90] sm:$0xff] (!%p219_p10), %vm289_vm0, %v2245_v12  ;;  %vm395_vm2 = vcmask (!%p219_p10), 1046528   ;;  %vm432_vm3 = vcmask (!%p219_p10), 1045504  }
  0x16   : > { %293 = vst.msk [vmem:[#allocation2 + $0xd8] sm:$0xff] (!%p219_p10), %vm289_vm0, %v2245_v12  ;;  %294 = vst.msk [vmem:[#allocation2 + $0x120] sm:$0xff] (!%p219_p10), %vm289_vm0, %v2245_v12  ;;  %v1930_v13 = vpack.c.bf16 (!%p219_p10), %v2394_v10, %v2389_v9  ;;  %v729_v15 = vld [vmem:[%s3430_s2 + $0x190] sm:$0xff] (!%p219_p10)  ;;  %v730_v16 = vld [vmem:[%s3430_s2 + $0x198] sm:$0xff] (!%p219_p10)  ;;  %1929 = vmatprep.subr.bf16.mxu1 (!%p219_p10), %v1928_v7  ;;  %s257_s13 = sand.u32 (!%p219_p10), 1, %s2219_s16   ;;  %s1597_s27 = sshll.u32 (!%p219_p10), %s2227_s18, 3 }
  0x17   : > { %295 = vst.msk [vmem:[#allocation2 + $0x168] sm:$0xff] (!%p219_p10), %vm289_vm0, %v2245_v12  ;;  %296 = vst.msk [vmem:[#allocation2 + $0x1b0] sm:$0xff] (!%p219_p10), %vm289_vm0, %v2245_v12  ;;  %1899 = vmatpush3.bf16.msra.mxu0 (!%p219_p10), %v1898_v8  ;;  %v1932_v18 = vpack.c.bf16 (!%p219_p10), %v730_v16, %v729_v15  ;;  %v681_v19 = vld [vmem:[%s3430_s2 + $0x10] sm:$0xff] (!%p219_p10)  ;;  %v682_v20 = vld [vmem:[%s3430_s2 + $0x18] sm:$0xff] (!%p219_p10)  ;;  %s2246_s26 = smov (!%p219_p10), [#allocation3]  }
  0x18   : > { %297 = vst.msk [vmem:[#allocation2 + $0x1f8] sm:$0xff] (!%p219_p10), %vm289_vm0, %v2245_v12  ;;  %299 = vst.msk [vmem:[#allocation2 + $0x50] sm:$0xff] (!%p219_p10), %vm289_vm0, %v2245_v12  ;;  %v713_v21 = vld [vmem:[%s3430_s2 + $0x110] sm:$0xff] (!%p219_p10)  ;;  %1931 = vmatpush3.bf16.msra.mxu1 (!%p219_p10), %v1930_v13  ;;  %v1902_v22 = vpack.c.bf16 (!%p219_p10), %v682_v20, %v681_v19  ;;  %v714_v23 = vld [vmem:[%s3430_s2 + $0x118] sm:$0xff] (!%p219_p10)  ;;  %1901 = vmatprep.subr.bf16.mxu0 (!%p219_p10), %v1900_v17 }
  0x19   : > { %300 = vst.msk [vmem:[#allocation2 + $0x98] sm:$0xff] %vm289_vm0, %v2245_v12  ;;  %301 = vst.msk [vmem:[#allocation2 + $0xe0] sm:$0xff] %vm289_vm0, %v2245_v12  ;;  %s2562_s8 = scalar_select %p261_p12, %s2231_s19, 1  ;;  %v699_v24 = vld [vmem:[%s3430_s2 + $0xa0] sm:$0xff]  ;;  %v700_v25 = vld [vmem:[%s3430_s2 + $0xa8] sm:$0xff]  ;;  %1933 = vmatprep.subr.bf16.mxu1 %v1932_v18  ;;  %v1934_v26 = vpack.c.bf16 %v714_v23, %v713_v21 }
  0x1a   : > { %302 = vst.msk [vmem:[#allocation2 + $0x128] sm:$0xff] %vm289_vm0, %v2245_v12  ;;  %303 = vst.msk [vmem:[#allocation2 + $0x170] sm:$0xff] %vm289_vm0, %v2245_v12  ;;  %s2583_s24 = scalar_select %p263_p13, %s2361_s14, 19  ;;  %v1904_v27 = vpack.c.bf16 %v700_v25, %v699_v24  ;;  %v731_v28 = vld [vmem:[%s3430_s2 + $0x1a0] sm:$0xff]  ;;  %v732_v29 = vld [vmem:[%s3430_s2 + $0x1a8] sm:$0xff] }
  0x1b   : > { %304 = vst.msk [vmem:[#allocation2 + $0x1b8] sm:$0xff] %vm289_vm0, %v2245_v12  ;;  %305 = vst.msk [vmem:[#allocation2 + $0x200] sm:$0xff] %vm289_vm0, %v2245_v12  ;;  %v683_v30 = vld [vmem:[%s3430_s2 + $0x20] sm:$0xff]  ;;  %v1936_v31 = vpack.c.bf16 %v732_v29, %v731_v28  ;;  %v684_v32 = vld [vmem:[%s3430_s2 + $0x28] sm:$0xff]  ;;  %1903 = vmatpush3.bf16.msra.mxu0 %v1902_v22  ;;  %s3441_s10 = smul.u32 60, %s2562_s8 }
  0x1c   : > { %306 = vst.msk [vmem:[#allocation2 + $0x10] sm:$0xff] %vm289_vm0, %v2245_v12  ;;  %307 = vst.msk [vmem:[#allocation2 + $0x58] sm:$0xff] %vm289_vm0, %v2245_v12  ;;  %v715_v33 = vld [vmem:[%s3430_s2 + $0x120] sm:$0xff]  ;;  %v716_v34 = vld [vmem:[%s3430_s2 + $0x128] sm:$0xff]  ;;  %v1906_v35 = vpack.c.bf16 %v684_v32, %v683_v30  ;;  %s2072_s9 = smul.u32 3, %s2583_s24  ;;  %1935 = vmatpush3.bf16.msra.mxu1 %v1934_v26  ;;  %1905 = vmatprep.subr.bf16.mxu0 %v1904_v27 }
  0x1d   : > { %308 = vst.msk [vmem:[#allocation2 + $0xa0] sm:$0xff] %vm289_vm0, %v2245_v12  ;;  %309 = vst.msk [vmem:[#allocation2 + $0xe8] sm:$0xff] %vm289_vm0, %v2245_v12  ;;  %v701_v36 = vld [vmem:[%s3430_s2 + $0xb0] sm:$0xff]  ;;  %v702_v37 = vld [vmem:[%s3430_s2 + $0xb8] sm:$0xff]  ;;  %v1938_v39 = vpack.c.bf16 %v716_v34, %v715_v33  ;;  %1937 = vmatprep.subr.bf16.mxu1 %v1936_v31  ;;  %s3439_s24 = smul.u32 60, %s2562_s8  ;;  %s1598_s8 = sshll.u32 %s2231_s19, 5 }
  0x1e   : > { %310 = vst.msk [vmem:[#allocation2 + $0x130] sm:$0xff] %vm289_vm0, %v2245_v12  ;;  %311 = vst.msk [vmem:[#allocation2 + $0x178] sm:$0xff] %vm289_vm0, %v2245_v12  ;;  %v733_v38 = vld [vmem:[%s3430_s2 + $0x1b0] sm:$0xff]  ;;  %v1908_v40 = vpack.c.bf16 %v702_v37, %v701_v36  ;;  %v734_v41 = vld [vmem:[%s3430_s2 + $0x1b8] sm:$0xff] }
  0x1f   : > { %312 = vst.msk [vmem:[#allocation2 + $0x1c0] sm:$0xff] %vm289_vm0, %v2245_v12  ;;  %313 = vst.msk [vmem:[#allocation2 + $0x208] sm:$0xff] %vm289_vm0, %v2245_v12  ;;  %v685_v42 = vld [vmem:[%s3430_s2 + $0x30] sm:$0xff]  ;;  %v686_v43 = vld [vmem:[%s3430_s2 + $0x38] sm:$0xff]  ;;  %v1940_v44 = vpack.c.bf16 %v734_v41, %v733_v38  ;;  %1907 = vmatpush3.bf16.msra.mxu0 %v1906_v35  ;;  %s2652_s30 = sadd.s32 %s3439_s24, %s2072_s9 }
  0x20   : > { %314 = vst.msk [vmem:[#allocation2 + $0x18] sm:$0xff] %vm289_vm0, %v2245_v12  ;;  %315 = vst.msk [vmem:[#allocation2 + $0x60] sm:$0xff] %vm289_vm0, %v2245_v12  ;;  %v717_v45 = vld [vmem:[%s3430_s2 + $0x130] sm:$0xff]  ;;  %v718_v46 = vld [vmem:[%s3430_s2 + $0x138] sm:$0xff]  ;;  %v1910_v51 = vpack.c.bf16 %v686_v43, %v685_v42  ;;  %1939 = vmatpush3.bf16.msra.mxu1 %v1938_v39  ;;  %1909 = vmatprep.subr.bf16.mxu0 %v1908_v40  ;;  %s1577_s25 = sshll.u32 %s2652_s30, 3  ;;  %s1603_s30 = sadd.s32 4, %s2361_s14 }
  0x21   : > { %316 = vst.msk [vmem:[#allocation2 + $0xa8] sm:$0xff] %vm289_vm0, %v2245_v12  ;;  %317 = vst.msk [vmem:[#allocation2 + $0xf0] sm:$0xff] %vm289_vm0, %v2245_v12  ;;  %v703_v47 = vld [vmem:[%s3430_s2 + $0xc0] sm:$0xff]  ;;  %v704_v48 = vld [vmem:[%s3430_s2 + $0xc8] sm:$0xff]  ;;  %v1942_v52 = vpack.c.bf16 %v718_v46, %v717_v45  ;;  %1941 = vmatprep.subr.bf16.mxu1 %v1940_v44  ;;  %s2703_s23 = scalar_lea.vmem %s3428_s0, %s1577_s25  ;;  %p2774_p0 = scmp.lt.s32.totalorder %s1603_s30, 19 }
  0x22   : > { %318 = vst.msk [vmem:[#allocation2 + $0x138] sm:$0xff] %vm289_vm0, %v2245_v12  ;;  %319 = vst.msk [vmem:[#allocation2 + $0x180] sm:$0xff] %vm289_vm0, %v2245_v12  ;;  %v735_v49 = vld [vmem:[%s3430_s2 + $0x1c0] sm:$0xff]  ;;  %v736_v50 = vld [vmem:[%s3430_s2 + $0x1c8] sm:$0xff]  ;;  %v1912_v53 = vpack.c.bf16 %v704_v48, %v703_v47  ;;  %s3376_s14 = scalar_lea.sflag [#allocation4], %s257_s13 }
  0x23   : > { %320 = vst.msk [vmem:[#allocation2 + $0x1c8] sm:$0xff] %vm289_vm0, %v2245_v12  ;;  %321 = vst.msk [vmem:[#allocation2 + $0x210] sm:$0xff] %vm289_vm0, %v2245_v12  ;;  %v687_v54 = vld [vmem:[%s3430_s2 + $0x40] sm:$0xff]  ;;  %v688_v55 = vld [vmem:[%s3430_s2 + $0x48] sm:$0xff]  ;;  %v1944_v57 = vpack.c.bf16 %v736_v50, %v735_v49  ;;  %1911 = vmatpush3.bf16.msra.mxu0 %v1910_v51  ;;  %s3458_s30 = smov (!%p2774_p0, %s1603_s30), 19 }
  0x24   : > { %322 = vst.msk [vmem:[#allocation2 + $0x20] sm:$0xff] %vm289_vm0, %v2245_v12  ;;  %323 = vst.msk [vmem:[#allocation2 + $0x68] sm:$0xff] %vm289_vm0, %v2245_v12  ;;  %v719_v56 = vld [vmem:[%s3430_s2 + $0x140] sm:$0xff]  ;;  %v720_v58 = vld [vmem:[%s3430_s2 + $0x148] sm:$0xff]  ;;  %v1914_v63 = vpack.c.bf16 %v688_v55, %v687_v54  ;;  %1943 = vmatpush3.bf16.msra.mxu1 %v1942_v52  ;;  %1913 = vmatprep.subr.bf16.mxu0 %v1912_v53  ;;  %s2074_s5 = smul.u32 3, %s3458_s30  ;;  %s1575_s30 = sshll.u32 %s257_s13, 6 }
  0x25   : > { %324 = vst.msk [vmem:[#allocation2 + $0xb0] sm:$0xff] %vm289_vm0, %v2245_v12  ;;  %325 = vst.msk [vmem:[#allocation2 + $0xf8] sm:$0xff] %vm289_vm0, %v2245_v12  ;;  %v705_v59 = vld [vmem:[%s3430_s2 + $0xd0] sm:$0xff]  ;;  %v706_v60 = vld [vmem:[%s3430_s2 + $0xd8] sm:$0xff]  ;;  %v1946_v1 = vpack.c.bf16 %v720_v58, %v719_v56  ;;  %1945 = vmatprep.subr.bf16.mxu1 %v1944_v57  ;;  %s259_s19 = scalar_lea.vmem [#allocation3], %s1575_s30 }
  0x26   : > { %326 = vst.msk [vmem:[#allocation2 + $0x140] sm:$0xff] %vm289_vm0, %v2245_v12  ;;  %327 = vst.msk [vmem:[#allocation2 + $0x188] sm:$0xff] %vm289_vm0, %v2245_v12  ;;  %v737_v61 = vld [vmem:[%s3430_s2 + $0x1d0] sm:$0xff]  ;;  %v738_v62 = vld [vmem:[%s3430_s2 + $0x1d8] sm:$0xff]  ;;  %v1916_v2 = vpack.c.bf16 %v706_v60, %v705_v59  ;;  %s3003_s12 = sadd.s32 %s2074_s5, %s3441_s10 }
  0x27   : > { %328 = vst.msk [vmem:[#allocation2 + $0x1d0] sm:$0xff] %vm289_vm0, %v2245_v12  ;;  %329 = vst.msk [vmem:[#allocation2 + $0x218] sm:$0xff] %vm289_vm0, %v2245_v12  ;;  %v689_v0 = vld [vmem:[%s3430_s2 + $0x50] sm:$0xff]  ;;  %v690_v3 = vld [vmem:[%s3430_s2 + $0x58] sm:$0xff]  ;;  %v1948_v6 = vpack.c.bf16 %v738_v62, %v737_v61  ;;  %1915 = vmatpush3.bf16.msra.mxu0 %v1914_v63  ;;  %s1579_s11 = sshll.u32 %s3003_s12, 3  ;;  %s1460_s12 = sshll.u32 %s259_s19, 4  ;;  %s3372_s12 = int_to_ptr.vmem [resolvable:$true] %s1460_s12 }
  0x28   : > { %330 = vst.msk [vmem:[#allocation2 + $0x28] sm:$0xff] %vm289_vm0, %v2245_v12  ;;  %331 = vst.msk [vmem:[#allocation2 + $0x70] sm:$0xff] %vm289_vm0, %v2245_v12  ;;  %v721_v4 = vld [vmem:[%s3430_s2 + $0x150] sm:$0xff]  ;;  %v722_v5 = vld [vmem:[%s3430_s2 + $0x158] sm:$0xff]  ;;  %v1918_v13 = vpack.c.bf16 %v690_v3, %v689_v0  ;;  %1947 = vmatpush3.bf16.msra.mxu1 %v1946_v1  ;;  %1917 = vmatprep.subr.bf16.mxu0 %v1916_v2  ;;  %s3102_s9 = scalar_lea.vmem %s3429_s1, %s1579_s11  ;;  %s1457_s11 = sadd.s32 %s1598_s8, %s1597_s27 }
  0x29   : > { %332 = vst.msk [vmem:[#allocation2 + $0xb8] sm:$0xff] %vm289_vm0, %v2245_v12  ;;  %333 = vst.msk [vmem:[#allocation2 + $0x100] sm:$0xff] %vm289_vm0, %v2245_v12  ;;  %v707_v7 = vld [vmem:[%s3430_s2 + $0xe0] sm:$0xff]  ;;  %v708_v8 = vld [vmem:[%s3430_s2 + $0xe8] sm:$0xff]  ;;  %v1950_v17 = vpack.c.bf16 %v722_v5, %v721_v4  ;;  %1949 = vmatprep.subr.bf16.mxu1 %v1948_v6  ;;  %s1599_s18 = sshll.u32 %s1457_s11, 7  ;;  %s2149_s24 = scalar_lea.vmem %s3372_s12, 1024 }
  0x2a   : > { %334 = vst.msk [vmem:[#allocation2 + $0x148] sm:$0xff] %vm289_vm0, %v2245_v12  ;;  %335 = vst.msk [vmem:[#allocation2 + $0x190] sm:$0xff] %vm289_vm0, %v2245_v12  ;;  %v739_v9 = vld [vmem:[%s3430_s2 + $0x1e0] sm:$0xff]  ;;  %v740_v10 = vld [vmem:[%s3430_s2 + $0x1e8] sm:$0xff]  ;;  %v1920_v18 = vpack.c.bf16 %v708_v8, %v707_v7  ;;  %p2150_p1 = scmp.ne.s32.totalorder %s3372_s12, %s2149_s24 }
  0x2b   : > { %336 = vst.msk [vmem:[#allocation2 + $0x1d8] sm:$0xff] %vm289_vm0, %v2245_v12  ;;  %337 = vst.msk [vmem:[#allocation2 + $0x220] sm:$0xff] %vm289_vm0, %v2245_v12  ;;  %v2711_v11 = vld [vmem:[%s3430_s2 + $0x60] sm:$0xff]  ;;  %v2724_v15 = vld [vmem:[%s3430_s2 + $0x168] sm:$0xff]  ;;  %v1952_v22 = vpack.c.bf16 %v740_v10, %v739_v9  ;;  %1919 = vmatpush3.bf16.msra.mxu0 %v1918_v13 }
  0x2c   : > { %338 = vst.msk [vmem:[#allocation2 + $0x30] sm:$0xff] %vm289_vm0, %v2245_v12  ;;  %339 = vst.msk [vmem:[#allocation2 + $0x78] sm:$0xff] %vm289_vm0, %v2245_v12  ;;  %v2719_v14 = vld [vmem:[%s3430_s2 + $0x160] sm:$0xff]  ;;  %v2729_v16 = vld [vmem:[%s3430_s2 + $0xf0] sm:$0xff]  ;;  %1951 = vmatpush3.bf16.msra.mxu1 %v1950_v17  ;;  %1921 = vmatprep.subr.bf16.mxu0 %v1920_v18  ;;  %p2151_p2 = pnand %p2150_p1, %p2325_p3 }
  0x2d   : > { %340 = vst.msk [vmem:[#allocation2 + $0xc0] sm:$0xff] %vm289_vm0, %v2245_v12  ;;  %341 = vst.msk [vmem:[#allocation2 + $0x108] sm:$0xff] %vm289_vm0, %v2245_v12  ;;  %v710_v19 = vld [vmem:[%s3430_s2 + $0xf8] sm:$0xff]  ;;  %v362_v20 = vld [vmem:[%s2703_s23] sm:$0xff]  ;;  %v1954_v31 = vpack.c.bf16 %v2724_v15, %v2719_v14  ;;  %1953 = vmatprep.subr.bf16.mxu1 %v1952_v22 }
  0x2e   : > { %342 = vst.msk [vmem:[#allocation2 + $0x150] sm:$0xff] %vm289_vm0, %v2245_v12  ;;  %343 = vst.msk [vmem:[#allocation2 + $0x198] sm:$0xff] %vm289_vm0, %v2245_v12  ;;  %v363_v21 = vld [vmem:[%s2703_s23 + $0x8] sm:$0xff]  ;;  %v2740_v23 = vld [vmem:[%s3430_s2 + $0x1f0] sm:$0xff]  ;;  %v396_v25 = vrot.slane %v362_v20, 1  ;;  %v433_v28 = vrot.slane %v362_v20, 2  ;;  %v1924_v32 = vpack.c.bf16 %v710_v19, %v2729_v16  ;;  %p2152_p4 = pneg %p2151_p2 }
  0x2f   : > { %344 = vst.msk [vmem:[#allocation2 + $0x1e0] sm:$0xff] %vm289_vm0, %v2245_v12  ;;  %345 = vst.msk [vmem:[#allocation2 + $0x228] sm:$0xff] %vm289_vm0, %v2245_v12  ;;  %v742_v24 = vld [vmem:[%s3430_s2 + $0x1f8] sm:$0xff]  ;;  %v397_v26 = vrot.slane %v363_v21, 1  ;;  %v434_v29 = vrot.slane %v363_v21, 2  ;;  %v2761_v33 = vld [vmem:[%s3430_s2 + $0x70] sm:$0xff] }
  0x30   : > { %346 = vst.msk [vmem:[#allocation2 + $0x38] sm:$0xff] %vm289_vm0, %v2245_v12  ;;  %347 = vst.msk [vmem:[#allocation2 + $0x80] sm:$0xff] %vm289_vm0, %v2245_v12  ;;  %v2746_v27 = vld [vmem:[%s2703_s23 + $0x18] sm:$0xff]  ;;  %v2769_v35 = vld [vmem:[%s3430_s2 + $0x170] sm:$0xff]  ;;  %v1956_v37 = vpack.c.bf16 %v742_v24, %v2740_v23  ;;  %1955 = vmatpush3.bf16.msra.mxu1 %v1954_v31 }
  0x31   : > { %348 = vst.msk [vmem:[#allocation2 + $0xc8] sm:$0xff] %vm289_vm0, %v2245_v12  ;;  %349 = vst.msk [vmem:[#allocation2 + $0x110] sm:$0xff] %vm289_vm0, %v2245_v12  ;;  %v694_v34 = vld [vmem:[%s3430_s2 + $0x78] sm:$0xff]  ;;  %v398_v36 = vsel %vm395_vm2, %v396_v25, %v397_v26  ;;  %v494_v39 = vrot.slane %v2746_v27, 1  ;;  %v521_v40 = vrot.slane %v2746_v27, 2  ;;  %v435_v41 = vsel %vm432_vm3, %v433_v28, %v434_v29  ;;  %v1581_v43 = vld [vmem:[%s2703_s23 + $0x20] sm:$0xff] }
  0x32   : > { %350 = vst.msk [vmem:[#allocation2 + $0x158] sm:$0xff] %vm289_vm0, %v2245_v12  ;;  %351 = vst.msk [vmem:[#allocation2 + $0x1a0] sm:$0xff] %vm289_vm0, %v2245_v12  ;;  %v726_v38 = vld [vmem:[%s3430_s2 + $0x178] sm:$0xff]  ;;  %v364_v42 = vld [vmem:[%s2703_s23 + $0x10] sm:$0x3]  ;;  %v2796_v47 = vrot.slane %v1581_v43, 1  ;;  %v1926_v53 = vpack.c.bf16 %v694_v34, %v2761_v33  ;;  %1957 = vmatprep.subr.bf16.mxu1 %v1956_v37 }
  0x33   : > { %352 = vst.msk [vmem:[#allocation2 + $0x1e8] sm:$0xff] %vm289_vm0, %v2245_v12  ;;  %353 = vst.msk [vmem:[#allocation2 + $0x230] sm:$0xff] %vm289_vm0, %v2245_v12  ;;  %v759_v44 = vld [vmem:[%s3430_s2 + $0x280] sm:$0xff]  ;;  %v760_v45 = vld [vmem:[%s3430_s2 + $0x288] sm:$0xff]  ;;  %v399_v46 = vrot.slane %v364_v42, 1  ;;  %v2798_v48 = vrot.slane %v1581_v43, 2  ;;  %v1958_v59 = vpack.c.bf16 %v726_v38, %v2769_v35 }
  0x34   : > { %354 = vst.msk [vmem:[#allocation2 + $0x40] sm:$0xff] %vm289_vm0, %v2245_v12  ;;  %355 = vst.msk [vmem:[#allocation2 + $0x88] sm:$0xff] %vm289_vm0, %v2245_v12  ;;  %v436_v49 = vrot.slane %v364_v42, 2  ;;  %v791_v50 = vld [vmem:[%s3430_s2 + $0x380] sm:$0xff]  ;;  %v792_v51 = vld [vmem:[%s3430_s2 + $0x388] sm:$0xff]  ;;  %v1960_v60 = vpack.c.bf16 %v760_v45, %v759_v44  ;;  %v403_v0 = vsel %vm395_vm2, %v494_v39, %v2796_v47 }
  0x35   : > { %356 = vst.msk [vmem:[#allocation2 + $0xd0] sm:$0xff] %vm289_vm0, %v2245_v12  ;;  %357 = vst.msk [vmem:[#allocation2 + $0x118] sm:$0xff] %vm289_vm0, %v2245_v12  ;;  %v2810_v52 = vld [vmem:[%s3430_s2 + $0x200] sm:$0xff]  ;;  %v2816_v54 = vld [vmem:[%s3430_s2 + $0x208] sm:$0xff]  ;;  %v400_v56 = vsel %vm395_vm2, %v397_v26, %v399_v46  ;;  %v1992_v2 = vpack.c.bf16 %v792_v51, %v791_v50  ;;  %v440_v5 = vsel %vm432_vm3, %v521_v40, %v2798_v48  ;;  %1959 = vmatpush3.bf16.msra.mxu1 %v1958_v59 }
  0x36   : > { %358 = vst.msk [vmem:[#allocation2 + $0x160] sm:$0xff] %vm289_vm0, %v2245_v12  ;;  %359 = vst.msk [vmem:[#allocation2 + $0x1a8] sm:$0xff] %vm289_vm0, %v2245_v12  ;;  %v2821_v55 = vld [vmem:[%s3430_s2 + $0x300] sm:$0xff]  ;;  %v437_v57 = vsel %vm432_vm3, %v434_v29, %v436_v49  ;;  %v2826_v58 = vld [vmem:[%s2703_s23 + $0x30] sm:$0xff] }
  0x37   : > { %360 = vst.msk [vmem:[#allocation2 + $0x1f0] sm:$0xff] %vm289_vm0, %v2245_v12  ;;  %361 = vst.msk [vmem:[#allocation2 + $0x238] sm:$0xff] %vm289_vm0, %v2245_v12  ;;  %v692_v12 = vld [vmem:[%s3430_s2 + $0x68] sm:$0xff]  ;;  %v2839_v62 = vld [vmem:[%s3430_s2 + $0x290] sm:$0xff]  ;;  %v499_v15 = vrot.slane %v2826_v58, 1  ;;  %1993 = vmatprep.subr.bf16.mxu1 %v1992_v2 }
  0x38   : > { %375 = vst.msk [vmem:[#allocation2] sm:$0xff] %vm374_vm1, %v362_v20  ;;  %376 = vst.msk [vmem:[#allocation2 + $0x48] sm:$0xff] %vm374_vm1, %v363_v21  ;;  %v1922_v30 = vpack.c.bf16 %v692_v12, %v2711_v11  ;;  %v2832_v61 = vld [vmem:[%s3430_s2 + $0x308] sm:$0xff]  ;;  %v2844_v63 = vld [vmem:[%s3430_s2 + $0x298] sm:$0xff]  ;;  %v1962_v11 = vpack.c.bf16 %v2816_v54, %v2810_v52  ;;  %v526_v21 = vrot.slane %v2826_v58, 2 }
  0x39   : > { %479 = vst.msk [vmem:[#allocation2 + $0x18] sm:$0xff] %vm374_vm1, %v2746_v27  ;;  %377 = vst.msk [vmem:[#allocation2 + $0x90] sm:$0xff] %vm374_vm1, %v2746_v27  ;;  %v2857_v3 = vld [vmem:[%s3430_s2 + $0x390] sm:$0xff]  ;;  %v2862_v4 = vld [vmem:[%s3430_s2 + $0x398] sm:$0xff]  ;;  %v1994_v14 = vpack.c.bf16 %v2832_v61, %v2821_v55  ;;  %v1964_v19 = vpack.c.bf16 %v2844_v63, %v2839_v62 }
  0x3a   : > { %424 = vst.msk [vmem:[#allocation2 + $0x8] sm:$0xff] %vm374_vm1, %v398_v36  ;;  %461 = vst.msk [vmem:[#allocation2 + $0x10] sm:$0xff] %vm374_vm1, %v435_v41  ;;  %1923 = vmatpush3.bf16.msra.mxu0 %v1922_v30  ;;  %v2876_v6 = vld [vmem:[%s3430_s2 + $0x210] sm:$0xff]  ;;  %v2881_v7 = vld [vmem:[%s3430_s2 + $0x218] sm:$0xff]  ;;  %v1996_v20 = vpack.c.bf16 %v2862_v4, %v2857_v3 }
  0x3b   : > { %480 = vst.msk [vmem:[#allocation2 + $0x60] sm:$0xff] %vm374_vm1, %v1581_v43  ;;  %378 = vst.msk [vmem:[#allocation2 + $0xd8] sm:$0xff] %vm374_vm1, %v1581_v43  ;;  %1925 = vmatprep.subr.bf16.mxu0 %v1924_v32  ;;  %v2886_v8 = vld [vmem:[%s3430_s2 + $0x310] sm:$0xff]  ;;  %v2896_v12 = vld [vmem:[%s3430_s2 + $0x318] sm:$0xff]  ;;  %v1966_v33 = vpack.c.bf16 %v2881_v7, %v2876_v6 }
  0x3c   : > { %425 = vst.msk [vmem:[#allocation2 + $0x50] sm:$0xff] %vm374_vm1, %v400_v56  ;;  %462 = vst.msk [vmem:[#allocation2 + $0x58] sm:$0xff] %vm374_vm1, %v437_v57  ;;  %v2904_v16 = vld [vmem:[%s3430_s2 + $0x2a0] sm:$0xff]  ;;  %v2909_v17 = vld [vmem:[%s3430_s2 + $0x2a8] sm:$0xff]  ;;  %v1998_v34 = vpack.c.bf16 %v2896_v12, %v2886_v8 }
  0x3d   : > { %481 = vst.msk [vmem:[#allocation2 + $0xa8] sm:$0xff] %vm374_vm1, %v2826_v58  ;;  %379 = vst.msk [vmem:[#allocation2 + $0x120] sm:$0xff] %vm374_vm1, %v2826_v58  ;;  %v2919_v22 = vld [vmem:[%s3430_s2 + $0x3a0] sm:$0xff]  ;;  %v2924_v23 = vld [vmem:[%s3430_s2 + $0x3a8] sm:$0xff]  ;;  %v1968_v46 = vpack.c.bf16 %v2909_v17, %v2904_v16 }
  0x3e   : > { %581 = vst.msk [vmem:[#allocation2 + $0x30] sm:$0xff] %vm374_vm1, %v2826_v58  ;;  %426 = vst.msk [vmem:[#allocation2 + $0x98] sm:$0xff] %vm374_vm1, %v403_v0  ;;  %1927 = vmatpush3.bf16.msra.mxu0 %v1926_v53  ;;  %v367_v24 = vld [vmem:[%s2703_s23 + $0x28] sm:$0x3]  ;;  %v1584_v25 = vld [vmem:[%s2703_s23 + $0x38] sm:$0xff]  ;;  %v2000_v51 = vpack.c.bf16 %v2924_v23, %v2919_v22 }
  0x3f   : > { %463 = vst.msk [vmem:[#allocation2 + $0xa0] sm:$0xff] %vm374_vm1, %v440_v5  ;;  %542 = vst.msk [vmem:[#allocation2 + $0x28] sm:$0xff] %vm374_vm1, %v440_v5  ;;  %v824_v10 = vld [vmem:[#allocation2] sm:$0xff]  ;;  %1961 = vmatprep.subr.bf16.mxu0 %v1960_v60  ;;  %v833_v18 = vld [vmem:[#allocation2 + $0x48] sm:$0xff]  ;;  %v404_v28 = vrot.slane %v367_v24, 1  ;;  %v2935_v29 = vrot.slane %v1584_v25, 1 }
  0x40   : > { %v827_v1 = vld [vmem:[#allocation2 + $0x18] sm:$0xff]  ;;  %515 = vst.msk [vmem:[#allocation2 + $0x20] sm:$0xff] %vm374_vm1, %v403_v0  ;;  %v2932_v27 = vld [vmem:[%s3430_s2 + $0x220] sm:$0xff]  ;;  %482 = vst.msk [vmem:[#allocation2 + $0xf0] sm:$0xff] %vm374_vm1, %v1584_v25  ;;  %v2937_v30 = vrot.slane %v1584_v25, 2  ;;  %v441_v31 = vrot.slane %v367_v24, 2 }
  0x41   : > { %1071 = vmatprep.mubr.f32.mxu1 %v827_v1  ;;  %v825_v9 = vld [vmem:[#allocation2 + $0x8] sm:$0xff]  ;;  %v826_v13 = vld [vmem:[#allocation2 + $0x10] sm:$0xff]  ;;  %380 = vst.msk [vmem:[#allocation2 + $0x168] sm:$0xff] %vm374_vm1, %v1584_v25  ;;  %582 = vst.msk [vmem:[#allocation2 + $0x78] sm:$0xff] %vm374_vm1, %v1584_v25  ;;  %v405_v39 = vsel %vm395_vm2, %v2796_v47, %v404_v28  ;;  %v408_v42 = vsel %vm395_vm2, %v499_v15, %v2935_v29 }
  0x42   : > { %966 = vmatprep.mubr.f32.mxu0 %v825_v9  ;;  %v836_v26 = vld [vmem:[#allocation2 + $0x60] sm:$0xff]  ;;  %1072 = vmatmul.mubr.f32.vlgmr.msra.gmra.mrb[0].mxu1 %v826_v13  ;;  %v2948_v35 = vld [vmem:[%s3430_s2 + $0x228] sm:$0xff]  ;;  %v442_v40 = vsel %vm432_vm3, %v2798_v48, %v441_v31  ;;  %v2967_v41 = vld [vmem:[%s3430_s2 + $0x2b0] sm:$0xff]  ;;  %427 = vst.msk [vmem:[#allocation2 + $0xe0] sm:$0xff] %vm374_vm1, %v405_v39  ;;  %v445_v50 = vsel %vm432_vm3, %v526_v21, %v2937_v30 }
  0x43   : > { %967 = vmatmul.mubr.f32.vlgmr.msra.gmra.mrb[0].mxu0 %v824_v10  ;;  %v834_v32 = vld [vmem:[#allocation2 + $0x50] sm:$0xff]  ;;  %v2953_v36 = vld [vmem:[%s3430_s2 + $0x320] sm:$0xff]  ;;  %1995 = vmatpush3.bf16.msra.mxu1 %v1994_v14  ;;  %v835_v37 = vld [vmem:[#allocation2 + $0x58] sm:$0xff]  ;;  %464 = vst.msk [vmem:[#allocation2 + $0xe8] sm:$0xff] %vm374_vm1, %v442_v40  ;;  %v1970_v56 = vpack.c.bf16 %v2948_v35, %v2932_v27 }
  0x44   : > { %1963 = vmatpush3.bf16.msra.mxu0 %v1962_v11  ;;  %971 = vmatprep.mubr.f32.mxu0 %v834_v32  ;;  %v2958_v38 = vld [vmem:[%s3430_s2 + $0x328] sm:$0xff]  ;;  %v842_v45 = vld [vmem:[#allocation2 + $0x90] sm:$0xff]  ;;  %v2978_v49 = vld [vmem:[%s3430_s2 + $0x2b8] sm:$0xff]  ;;  %428 = vst.msk [vmem:[#allocation2 + $0x128] sm:$0xff] %vm374_vm1, %v408_v42 }
  0x45   : > { %1076 = vmatprep.mubr.f32.mxu1 %v836_v26  ;;  %1965 = vmatprep.subr.bf16.mxu0 %v1964_v19  ;;  %v843_v43 = vld [vmem:[#allocation2 + $0x98] sm:$0xff]  ;;  %v845_v44 = vld [vmem:[#allocation2 + $0xa8] sm:$0xff]  ;;  %v2988_v52 = vld [vmem:[%s3430_s2 + $0x3b0] sm:$0xff]  ;;  %465 = vst.msk [vmem:[#allocation2 + $0x130] sm:$0xff] %vm374_vm1, %v445_v50  ;;  %v2002_v59 = vpack.c.bf16 %v2958_v38, %v2953_v36  ;;  %v1972_v1 = vpack.c.bf16 %v2978_v49, %v2967_v41 }
  0x46   : > { %1997 = vmatprep.subr.bf16.mxu1 %v1996_v20  ;;  %v2993_v53 = vld [vmem:[%s3430_s2 + $0x3b8] sm:$0xff]  ;;  %v2996_v54 = vld [vmem:[%s2703_s23 + $0x48] sm:$0xff]  ;;  %605 = vst.msk [vmem:[#allocation2 + $0x38] sm:$0xff] %vm374_vm1, %v408_v42  ;;  %1077 = vmatmul.mubr.f32.gmra.mrb[2].mxu1 %v835_v37  ;;  %v844_v55 = vld [vmem:[#allocation2 + $0xa0] sm:$0xff] }
  0x47   : > { %972 = vmatmul.mubr.f32.gmra.mrb[2].mxu0 %v833_v18  ;;  %v3011_v57 = vld [vmem:[%s3430_s2 + $0x230] sm:$0xff]  ;;  %v3016_v58 = vld [vmem:[%s3430_s2 + $0x238] sm:$0xff]  ;;  %483 = vst.msk [vmem:[#allocation2 + $0x138] sm:$0xff] %vm374_vm1, %v2996_v54  ;;  %381 = vst.msk [vmem:[#allocation2 + $0x1b0] sm:$0xff] %vm374_vm1, %v2996_v54  ;;  %1999 = vmatpush3.bf16.msra.mxu1 %v1998_v34  ;;  %v504_v2 = vrot.slane %v2996_v54, 1  ;;  %v531_v3 = vrot.slane %v2996_v54, 2  ;;  %v2004_v6 = vpack.c.bf16 %v2993_v53, %v2988_v52 }
  0x48   : > { %1967 = vmatpush3.bf16.msra.mxu0 %v1966_v33  ;;  %544 = vst.msk [vmem:[#allocation2 + $0xb8] sm:$0xff] %vm374_vm1, %v445_v50  ;;  %583 = vst.msk [vmem:[#allocation2 + $0xc0] sm:$0xff] %vm374_vm1, %v2996_v54  ;;  %976 = vmatprep.mubr.f32.mxu0 %v843_v43  ;;  %v3032_v60 = vld [vmem:[%s3430_s2 + $0x330] sm:$0xff]  ;;  %v3037_v61 = vld [vmem:[%s3430_s2 + $0x338] sm:$0xff]  ;;  %v1974_v10 = vpack.c.bf16 %v3016_v58, %v3011_v57 }
  0x49   : > { %517 = vst.msk [vmem:[#allocation2 + $0xb0] sm:$0xff] %vm374_vm1, %v408_v42  ;;  %623 = vst.msk [vmem:[#allocation2 + $0x40] sm:$0xff] %vm374_vm1, %v445_v50  ;;  %v3042_v62 = vld [vmem:[%s3430_s2 + $0x2c0] sm:$0xff]  ;;  %1081 = vmatprep.mubr.f32.mxu1 %v845_v44  ;;  %1969 = vmatprep.subr.bf16.mxu0 %v1968_v46  ;;  %v854_v63 = vld [vmem:[#allocation2 + $0xf0] sm:$0xff]  ;;  %v2006_v19 = vpack.c.bf16 %v3037_v61, %v3032_v60 }
  0x4a   : > { %v851_v0 = vld [vmem:[#allocation2 + $0xd8] sm:$0xff]  ;;  %v3051_v4 = vld [vmem:[%s3430_s2 + $0x2c8] sm:$0xff]  ;;  %v3056_v5 = vld [vmem:[%s3430_s2 + $0x3c0] sm:$0xff]  ;;  %2001 = vmatprep.subr.bf16.mxu1 %v2000_v51  ;;  %1082 = vmatmul.mubr.f32.gmra.mrb[4].mxu1 %v844_v55 }
  0x4b   : > { %977 = vmatmul.mubr.f32.gmra.mrb[4].mxu0 %v842_v45  ;;  %v3064_v7 = vld [vmem:[%s3430_s2 + $0x3c8] sm:$0xff]  ;;  %v370_v8 = vld [vmem:[%s2703_s23 + $0x40] sm:$0x3]  ;;  %v1587_v9 = vld [vmem:[%s2703_s23 + $0x50] sm:$0xff]  ;;  %2003 = vmatpush3.bf16.msra.mxu1 %v2002_v59  ;;  %v1976_v20 = vpack.c.bf16 %v3051_v4, %v3042_v62 }
  0x4c   : > { %1971 = vmatpush3.bf16.msra.mxu0 %v1970_v56  ;;  %v3073_v11 = vld [vmem:[%s3430_s2 + $0x240] sm:$0xff]  ;;  %v3078_v12 = vld [vmem:[%s3430_s2 + $0x248] sm:$0xff]  ;;  %v409_v14 = vrot.slane %v370_v8, 1  ;;  %484 = vst.msk [vmem:[#allocation2 + $0x180] sm:$0xff] %vm374_vm1, %v1587_v9  ;;  %v3086_v15 = vrot.slane %v1587_v9, 1  ;;  %v3088_v16 = vrot.slane %v1587_v9, 2  ;;  %1086 = vmatprep.mubr.f32.mxu1 %v854_v63  ;;  %v2008_v32 = vpack.c.bf16 %v3064_v7, %v3056_v5 }
  0x4d   : > { %v3083_v13 = vld [vmem:[%s3430_s2 + $0x340] sm:$0xff]  ;;  %382 = vst.msk [vmem:[#allocation2 + $0x1f8] sm:$0xff] %vm374_vm1, %v1587_v9  ;;  %584 = vst.msk [vmem:[#allocation2 + $0x108] sm:$0xff] %vm374_vm1, %v1587_v9  ;;  %v853_v18 = vld [vmem:[#allocation2 + $0xe8] sm:$0xff]  ;;  %v446_v22 = vrot.slane %v370_v8, 2  ;;  %1973 = vmatprep.subr.bf16.mxu0 %v1972_v1  ;;  %2005 = vmatprep.subr.bf16.mxu1 %v2004_v6  ;;  %v1978_v38 = vpack.c.bf16 %v3078_v12, %v3073_v11 }
  0x4e   : > { %v852_v17 = vld [vmem:[#allocation2 + $0xe0] sm:$0xff]  ;;  %v784_v21 = vld [vmem:[%s3430_s2 + $0x348] sm:$0xff]  ;;  %v410_v24 = vsel %vm395_vm2, %v2935_v29, %v409_v14  ;;  %v3109_v25 = vld [vmem:[%s3430_s2 + $0x2d0] sm:$0xff]  ;;  %v413_v27 = vsel %vm395_vm2, %v504_v2, %v3086_v15  ;;  %v450_v28 = vsel %vm432_vm3, %v531_v3, %v3088_v16  ;;  %1087 = vmatmul.mubr.f32.gmra.mrb[6].mxu1 %v853_v18 }
  0x4f   : > { %981 = vmatprep.mubr.f32.mxu0 %v852_v17  ;;  %v861_v23 = vld [vmem:[#allocation2 + $0x128] sm:$0xff]  ;;  %v3114_v26 = vld [vmem:[%s3430_s2 + $0x2d8] sm:$0xff]  ;;  %429 = vst.msk [vmem:[#allocation2 + $0x170] sm:$0xff] %vm374_vm1, %v410_v24  ;;  %v447_v33 = vsel %vm432_vm3, %v2937_v30, %v446_v22  ;;  %v801_v34 = vld [vmem:[%s3430_s2 + $0x3d0] sm:$0xff]  ;;  %2007 = vmatpush3.bf16.msra.mxu1 %v2006_v19  ;;  %v2010_v40 = vpack.c.bf16 %v784_v21, %v3083_v13 }
  0x50   : > { %982 = vmatmul.mubr.f32.gmra.mrb[6].mxu0 %v851_v0  ;;  %v863_v31 = vld [vmem:[#allocation2 + $0x138] sm:$0xff]  ;;  %430 = vst.msk [vmem:[#allocation2 + $0x1b8] sm:$0xff] %vm374_vm1, %v413_v27  ;;  %467 = vst.msk [vmem:[#allocation2 + $0x1c0] sm:$0xff] %vm374_vm1, %v450_v28  ;;  %v860_v36 = vld [vmem:[#allocation2 + $0x120] sm:$0xff]  ;;  %v1980_v44 = vpack.c.bf16 %v3114_v26, %v3109_v25  ;;  %2009 = vmatprep.subr.bf16.mxu1 %v2008_v32 }
  0x51   : > { %v802_v35 = vld [vmem:[%s3430_s2 + $0x3d8] sm:$0xff]  ;;  %1975 = vmatpush3.bf16.msra.mxu0 %v1974_v10  ;;  %v862_v37 = vld [vmem:[#allocation2 + $0x130] sm:$0xff]  ;;  %466 = vst.msk [vmem:[#allocation2 + $0x178] sm:$0xff] %vm374_vm1, %v447_v33  ;;  %v548_v39 = vld [vmem:[%s3102_s9] sm:$0xff]  ;;  %986 = vmatprep.mubr.f32.mxu0 %v861_v23 }
  0x52   : > { %607 = vst.msk [vmem:[#allocation2 + $0xc8] sm:$0xff] %vm374_vm1, %v413_v27  ;;  %v3142_v41 = vld [vmem:[%s3430_s2 + $0x250] sm:$0xff]  ;;  %v3147_v42 = vld [vmem:[%s3430_s2 + $0x258] sm:$0xff]  ;;  %551 = vst.msk [vmem:[#allocation2 + $0x1c8] sm:$0xff] %vm374_vm1, %v548_v39  ;;  %1091 = vmatprep.mubr.f32.mxu1 %v863_v31  ;;  %1977 = vmatprep.subr.bf16.mxu0 %v1976_v20  ;;  %v2012_v45 = vpack.c.bf16 %v802_v35, %v801_v34  ;;  %v556_v52 = vrot.slane %v548_v39, 1  ;;  %v565_v53 = vrot.slane %v548_v39, 2 }
  0x53   : > { %v3152_v43 = vld [vmem:[%s3430_s2 + $0x350] sm:$0xff]  ;;  %546 = vst.msk [vmem:[#allocation2 + $0x148] sm:$0xff] %vm374_vm1, %v450_v28  ;;  %633 = vst.msk [vmem:[#allocation2 + $0x150] sm:$0xff] %vm374_vm1, %v548_v39  ;;  %v786_v46 = vld [vmem:[%s3430_s2 + $0x358] sm:$0xff]  ;;  %1092 = vmatmul.mubr.f32.gmra.mrb[8].mxu1 %v862_v37  ;;  %v1982_v57 = vpack.c.bf16 %v3147_v42, %v3142_v41 }
  0x54   : > { %519 = vst.msk [vmem:[#allocation2 + $0x140] sm:$0xff] %vm374_vm1, %v413_v27  ;;  %625 = vst.msk [vmem:[#allocation2 + $0xd0] sm:$0xff] %vm374_vm1, %v450_v28  ;;  %v3167_v49 = vld [vmem:[%s3430_s2 + $0x2e0] sm:$0xff]  ;;  %v3172_v50 = vld [vmem:[%s3430_s2 + $0x2e8] sm:$0xff]  ;;  %987 = vmatmul.mubr.f32.gmra.mrb[8].mxu0 %v860_v36  ;;  %2011 = vmatpush3.bf16.msra.mxu1 %v2010_v40  ;;  %v2014_v60 = vpack.c.bf16 %v786_v46, %v3152_v43 }
  0x55   : > { %v872_v51 = vld [vmem:[#allocation2 + $0x180] sm:$0xff]  ;;  %v804_v55 = vld [vmem:[%s3430_s2 + $0x3e8] sm:$0xff]  ;;  %1979 = vmatpush3.bf16.msra.mxu0 %v1978_v38  ;;  %v373_v58 = vld [vmem:[%s2703_s23 + $0x58] sm:$0x3]  ;;  %2013 = vmatprep.subr.bf16.mxu1 %v2012_v45  ;;  %v1984_v4 = vpack.c.bf16 %v3172_v50, %v3167_v49 }
  0x56   : > { %v803_v54 = vld [vmem:[%s3430_s2 + $0x3e0] sm:$0xff]  ;;  %v869_v56 = vld [vmem:[#allocation2 + $0x168] sm:$0xff]  ;;  %1096 = vmatprep.mubr.f32.mxu1 %v872_v51  ;;  %v414_v0 = vrot.slane %v373_v58, 1  ;;  %v870_v3 = vld [vmem:[#allocation2 + $0x170] sm:$0xff]  ;;  %1981 = vmatprep.subr.bf16.mxu0 %v1980_v44  ;;  %v451_v7 = vrot.slane %v373_v58, 2 }
  0x57   : > { %v549_v59 = vld [vmem:[%s3102_s9 + $0x8] sm:$0xff]  ;;  %v755_v61 = vld [vmem:[%s3430_s2 + $0x260] sm:$0xff]  ;;  %v2016_v5 = vpack.c.bf16 %v804_v55, %v803_v54  ;;  %v773_v8 = vld [vmem:[%s3430_s2 + $0x2f0] sm:$0xff]  ;;  %991 = vmatprep.mubr.f32.mxu0 %v870_v3 }
  0x58   : > { %v756_v62 = vld [vmem:[%s3430_s2 + $0x268] sm:$0xff]  ;;  %v787_v63 = vld [vmem:[%s3430_s2 + $0x360] sm:$0xff]  ;;  %552 = vst.msk [vmem:[#allocation2 + $0x210] sm:$0xff] %vm374_vm1, %v549_v59  ;;  %v3195_v1 = vrot.slane %v549_v59, 1  ;;  %v3197_v2 = vrot.slane %v549_v59, 2  ;;  %634 = vst.msk [vmem:[#allocation2 + $0x198] sm:$0xff] %vm374_vm1, %v549_v59  ;;  %v415_v11 = vsel %vm395_vm2, %v3086_v15, %v414_v0  ;;  %992 = vmatmul.mubr.f32.gmra.mrb[10].mxu0 %v869_v56  ;;  %v452_v18 = vsel %vm432_vm3, %v3088_v16, %v451_v7 }
  0x59   : > { %v788_v6 = vld [vmem:[%s3430_s2 + $0x368] sm:$0xff]  ;;  %v871_v9 = vld [vmem:[#allocation2 + $0x178] sm:$0xff]  ;;  %431 = vst.msk [vmem:[#allocation2 + $0x200] sm:$0xff] %vm374_vm1, %v415_v11  ;;  %v805_v19 = vld [vmem:[%s3430_s2 + $0x3f0] sm:$0xff]  ;;  %1983 = vmatpush3.bf16.msra.mxu0 %v1982_v57  ;;  %2015 = vmatpush3.bf16.msra.mxu1 %v2014_v60  ;;  %v1986_v23 = vpack.c.bf16 %v756_v62, %v755_v61 }
  0x5a   : > { %v879_v10 = vld [vmem:[#allocation2 + $0x1b8] sm:$0xff]  ;;  %v645_v13 = vsel %vm395_vm2, %v556_v52, %v3195_v1  ;;  %v567_v14 = vsel %vm432_vm3, %v565_v53, %v3197_v2  ;;  %1097 = vmatmul.mubr.f32.gmra.mrb[10].mxu1 %v871_v9  ;;  %v881_v17 = vld [vmem:[#allocation2 + $0x1c8] sm:$0xff]  ;;  %v878_v21 = vld [vmem:[#allocation2 + $0x1b0] sm:$0xff]  ;;  %v2018_v24 = vpack.c.bf16 %v788_v6, %v787_v63  ;;  %468 = vst.msk [vmem:[#allocation2 + $0x208] sm:$0xff] %vm374_vm1, %v452_v18 }
  0x5b   : > { %v774_v12 = vld [vmem:[%s3430_s2 + $0x2f8] sm:$0xff]  ;;  %657 = vst.msk [vmem:[#allocation2 + $0x158] sm:$0xff] %vm374_vm1, %v645_v13  ;;  %572 = vst.msk [vmem:[#allocation2 + $0x1d8] sm:$0xff] %vm374_vm1, %v567_v14  ;;  %v880_v22 = vld [vmem:[#allocation2 + $0x1c0] sm:$0xff]  ;;  %996 = vmatprep.mubr.f32.mxu0 %v879_v10  ;;  %1101 = vmatprep.mubr.f32.mxu1 %v881_v17 }
  0x5c   : > { %v806_v20 = vld [vmem:[%s3430_s2 + $0x3f8] sm:$0xff]  ;;  %563 = vst.msk [vmem:[#allocation2 + $0x1d0] sm:$0xff] %vm374_vm1, %v645_v13  ;;  %675 = vst.msk [vmem:[#allocation2 + $0x160] sm:$0xff] %vm374_vm1, %v567_v14  ;;  %v1988_v25 = vpack.c.bf16 %v774_v12, %v773_v8  ;;  %v757_v26 = vld [vmem:[%s3430_s2 + $0x270] sm:$0xff]  ;;  %1985 = vmatprep.subr.bf16.mxu0 %v1984_v4  ;;  %2017 = vmatprep.subr.bf16.mxu1 %v2016_v5 }
  0x5d   : > { %v758_v27 = vld [vmem:[%s3430_s2 + $0x278] sm:$0xff]  ;;  %v2020_v28 = vpack.c.bf16 %v806_v20, %v805_v19  ;;  %v789_v31 = vld [vmem:[%s3430_s2 + $0x370] sm:$0xff]  ;;  %v1582_v33 = vld [vmem:[%s2703_s23 + $0x28] sm:$0x3]  ;;  %997 = vmatmul.mubr.f32.gmra.mrb[12].mxu0 %v878_v21  ;;  %2019 = vmatpush3.bf16.msra.mxu1 %v2018_v24 }
  0x5e   : > { %v790_v32 = vld [vmem:[%s3430_s2 + $0x378] sm:$0xff]  ;;  %1102 = vmatmul.mubr.f32.gmra.mrb[12].mxu1 %v880_v22  ;;  %v524_v35 = vrot.slane %v1582_v33, 2  ;;  %v1591_v36 = vld [vmem:[%s2703_s23 + $0x40] sm:$0x3]  ;;  %v497_v37 = vrot.slane %v1582_v33, 1  ;;  %1987 = vmatpush3.bf16.msra.mxu0 %v1986_v23  ;;  %v1990_v38 = vpack.c.bf16 %v758_v27, %v757_v26  ;;  %v808_v40 = vld [vmem:[%s3430_s2 + $0x408] sm:$0xff] }
  0x5f   : > { %v890_v34 = vld [vmem:[#allocation2 + $0x210] sm:$0xff]  ;;  %v807_v39 = vld [vmem:[%s3430_s2 + $0x400] sm:$0xff]  ;;  %v594_v41 = vrot.slane %v1591_v36, 1  ;;  %v612_v42 = vrot.slane %v1591_v36, 2  ;;  %v887_v43 = vld [vmem:[#allocation2 + $0x1f8] sm:$0xff]  ;;  %1989 = vmatprep.subr.bf16.mxu0 %v1988_v25  ;;  %v2022_v44 = vpack.c.bf16 %v790_v32, %v789_v31  ;;  %2021 = vmatprep.subr.bf16.mxu1 %v2020_v28 }
  0x60   : > { %1106 = vmatprep.mubr.f32.mxu1 %v890_v34  ;;  %v829_v45 = vld [vmem:[#allocation2 + $0x28] sm:$0xff]  ;;  %v831_v46 = vld [vmem:[#allocation2 + $0x38] sm:$0xff]  ;;  %v525_v49 = vsel %vm432_vm3, %v2798_v48, %v524_v35  ;;  %v498_v50 = vsel %vm395_vm2, %v2796_v47, %v497_v37  ;;  %v888_v51 = vld [vmem:[#allocation2 + $0x200] sm:$0xff]  ;;  %v2024_v55 = vpack.c.bf16 %v808_v40, %v807_v39 }
  0x61   : > { %543 = vst.msk [vmem:[#allocation2 + $0x70] sm:$0xff] %vm374_vm1, %v525_v49  ;;  %v595_v52 = vsel %vm395_vm2, %v2935_v29, %v594_v41  ;;  %516 = vst.msk [vmem:[#allocation2 + $0x68] sm:$0xff] %vm374_vm1, %v498_v50  ;;  %v809_v53 = vld [vmem:[%s3430_s2 + $0x410] sm:$0xff]  ;;  %v810_v48 = vld [vmem:[%s3430_s2 + $0x418] sm:$0xff]  ;;  %v613_v47 = vsel %vm432_vm3, %v2937_v30, %v612_v42  ;;  %1001 = vmatprep.mubr.f32.mxu0 %v888_v51  ;;  %2023 = vmatpush3.bf16.msra.mxu1 %v2022_v44 }
  0x62   : > { %v889_v54 = vld [vmem:[#allocation2 + $0x208] sm:$0xff]  ;;  %606 = vst.msk [vmem:[#allocation2 + $0x80] sm:$0xff] %vm374_vm1, %v595_v52  ;;  %v1585_v56 = vld [vmem:[%s2703_s23 + $0x40] sm:$0x3]  ;;  %v1594_v57 = vld [vmem:[%s2703_s23 + $0x58] sm:$0x3]  ;;  %1002 = vmatmul.mubr.f32.gmra.mrb[14].mxu0 %v887_v43  ;;  %v2028_v63 = vpack.c.bf16 %v810_v48, %v809_v53  ;;  %2056 = vmatprep.subr.bf16.mxu1 %v2024_v55 }
  0x63   : > { %624 = vst.msk [vmem:[#allocation2 + $0x88] sm:$0xff] %vm374_vm1, %v613_v47  ;;  %1107 = vmatmul.mubr.f32.gmra.mrb[14].mxu1 %v889_v54  ;;  %v529_v58 = vrot.slane %v1585_v56, 2  ;;  %v599_v59 = vrot.slane %v1594_v57, 1  ;;  %v502_v60 = vrot.slane %v1585_v56, 1  ;;  %1991 = vmatpush3.bf16.msra.mxu0 %v1990_v38  ;;  %v828_v61 = vld [vmem:[#allocation2 + $0x20] sm:$0xff]  ;;  %v830_v62 = vld [vmem:[#allocation2 + $0x30] sm:$0xff] }
  0x64   : > { %v617_v0 = vrot.slane %v1594_v57, 2  ;;  %1176 = vmatprep.mubr.f32.mxu0 %v829_v45  ;;  %1281 = vmatprep.mubr.f32.mxu1 %v831_v46  ;;  %v811_v3 = vld [vmem:[%s3430_s2 + $0x420] sm:$0xff]  ;;  %v812_v4 = vld [vmem:[%s3430_s2 + $0x428] sm:$0xff]  ;;  %v1588_v8 = vld [vmem:[%s2703_s23 + $0x58] sm:$0x3]  ;;  %s3370_s23 = scalar_lea.hbm %s3432_s4, %s1599_s18 }
  0x65   : > { %v530_v5 = vsel %vm432_vm3, %v2937_v30, %v529_v58  ;;  %v600_v6 = vsel %vm395_vm2, %v3086_v15, %v599_v59  ;;  %v503_v7 = vsel %vm395_vm2, %v2935_v29, %v502_v60  ;;  %2025 = vmatprep.subr.bf16.mxu0 %v2024_v55  ;;  %v629_v9 = vld [vmem:[%s3102_s9 + $0x10] sm:$0x3]  ;;  %v839_v30 = vld [vmem:[#allocation2 + $0x78] sm:$0xff]  ;;  %v534_v11 = vrot.slane %v1588_v8, 2  ;;  %v631_v25 = vld [vmem:[%s3102_s9 + $0x20] sm:$0xff] }
  0x66   : > { %545 = vst.msk [vmem:[#allocation2 + $0x100] sm:$0xff] %vm374_vm1, %v530_v5  ;;  %608 = vst.msk [vmem:[#allocation2 + $0x110] sm:$0xff] %vm374_vm1, %v600_v6  ;;  %v618_v10 = vsel %vm432_vm3, %v3088_v16, %v617_v0  ;;  %1177 = vmatmul.mubr.f32.vlgmr.msra.gmra.mrb[16].mxu0 %v828_v61  ;;  %v646_v12 = vrot.slane %v629_v9, 1  ;;  %v664_v29 = vrot.slane %v629_v9, 2  ;;  %v507_v13 = vrot.slane %v1588_v8, 1  ;;  %v847_v18 = vld [vmem:[#allocation2 + $0xb8] sm:$0xff] }
  0x67   : > { %518 = vst.msk [vmem:[#allocation2 + $0xf8] sm:$0xff] %vm374_vm1, %v503_v7  ;;  %1282 = vmatmul.mubr.f32.vlgmr.msra.gmra.mrb[16].mxu1 %v830_v62  ;;  %626 = vst.msk [vmem:[#allocation2 + $0x118] sm:$0xff] %vm374_vm1, %v618_v10  ;;  %2027 = vmatpush3.bf16.msra.mxu0 %v2024_v55  ;;  %v2032_v19 = vpack.c.bf16 %v812_v4, %v811_v3  ;;  %v535_v21 = vsel %vm432_vm3, %v3088_v16, %v534_v11  ;;  %v630_v24 = vld [vmem:[%s3102_s9 + $0x18] sm:$0xff]  ;;  %v849_v26 = vld [vmem:[#allocation2 + $0xc8] sm:$0xff]  ;;  %v649_v28 = vrot.slane %v631_v25, 1 }
  0x68   : > { %2064 = vmatpush3.bf16.msra.mxu1 %v2024_v55  ;;  %v838_v14 = vld [vmem:[#allocation2 + $0x70] sm:$0xff]  ;;  %v837_v17 = vld [vmem:[#allocation2 + $0x68] sm:$0xff]  ;;  %2029 = vmatprep.subr.bf16.mxu0 %v2028_v63  ;;  %v647_v22 = vsel %vm395_vm2, %v3195_v1, %v646_v12  ;;  %v508_v23 = vsel %vm395_vm2, %v3086_v15, %v507_v13  ;;  %v814_v16 = vld [vmem:[%s3430_s2 + $0x438] sm:$0xff]  ;;  %547 = vst.msk [vmem:[#allocation2 + $0x190] sm:$0xff] %vm374_vm1, %v535_v21  ;;  %v648_v15 = vrot.slane %v630_v24, 1  ;;  %v666_v32 = vrot.slane %v630_v24, 2 }
  0x69   : > { %1181 = vmatprep.mubr.f32.mxu0 %v838_v14  ;;  %v840_v20 = vld [vmem:[#allocation2 + $0x80] sm:$0xff]  ;;  %2057 = vmatprep.subr.bf16.mxu1 %v2028_v63  ;;  %v813_v27 = vld [vmem:[%s3430_s2 + $0x430] sm:$0xff]  ;;  %658 = vst.msk [vmem:[#allocation2 + $0x1a0] sm:$0xff] %vm374_vm1, %v647_v22  ;;  %520 = vst.msk [vmem:[#allocation2 + $0x188] sm:$0xff] %vm374_vm1, %v508_v23  ;;  %v665_v31 = vsel %vm432_vm3, %v3197_v2, %v664_v29  ;;  %v667_v35 = vrot.slane %v631_v25, 2 }
  0x6a   : > { %1286 = vmatprep.mubr.f32.mxu1 %v840_v20  ;;  %635 = vst.msk [vmem:[#allocation2 + $0x1e0] sm:$0xff] %vm374_vm1, %v630_v24  ;;  %636 = vst.msk [vmem:[#allocation2 + $0x228] sm:$0xff] %vm374_vm1, %v631_v25  ;;  %1182 = vmatmul.mubr.f32.gmra.mrb[18].mxu0 %v837_v17  ;;  %v550_v33 = vld [vmem:[%s3102_s9 + $0x10] sm:$0x3]  ;;  %v632_v34 = vld [vmem:[%s3102_s9 + $0x28] sm:$0x3]  ;;  %v650_v38 = vsel %vm395_vm2, %v648_v15, %v649_v28  ;;  %v2036_v42 = vpack.c.bf16 %v814_v16, %v813_v27 }
  0x6b   : > { %1287 = vmatmul.mubr.f32.gmra.mrb[18].mxu1 %v839_v30  ;;  %676 = vst.msk [vmem:[#allocation2 + $0x1a8] sm:$0xff] %vm374_vm1, %v665_v31  ;;  %2031 = vmatpush3.bf16.msra.mxu0 %v2028_v63  ;;  %v846_v36 = vld [vmem:[#allocation2 + $0xb0] sm:$0xff]  ;;  %v848_v37 = vld [vmem:[#allocation2 + $0xc0] sm:$0xff]  ;;  %v568_v39 = vrot.slane %v550_v33, 2  ;;  %v651_v40 = vrot.slane %v632_v34, 1  ;;  %v559_v41 = vrot.slane %v550_v33, 1  ;;  %v668_v43 = vsel %vm432_vm3, %v666_v32, %v667_v35 }
  0x6c   : > { %2065 = vmatpush3.bf16.msra.mxu1 %v2028_v63  ;;  %1186 = vmatprep.mubr.f32.mxu0 %v847_v18  ;;  %659 = vst.msk [vmem:[#allocation2 + $0x1e8] sm:$0xff] %vm374_vm1, %v650_v38  ;;  %v669_v44 = vrot.slane %v632_v34, 2  ;;  %677 = vst.msk [vmem:[#allocation2 + $0x1f0] sm:$0xff] %vm374_vm1, %v668_v43  ;;  %v815_v52 = vld [vmem:[%s3430_s2 + $0x440] sm:$0xff]  ;;  %v816_v53 = vld [vmem:[%s3430_s2 + $0x448] sm:$0xff]  ;;  %s2153_s9 = sshll.u32 %s2246_s26, 4  ;;  %s2154_s9 = int_to_ptr.vmem [resolvable:$false] %s2153_s9 }
  0x6d   : > { %1291 = vmatprep.mubr.f32.mxu1 %v849_v26  ;;  %2033 = vmatprep.subr.bf16.mxu0 %v2032_v19  ;;  %v856_v45 = vld [vmem:[#allocation2 + $0x100] sm:$0xff]  ;;  %v858_v46 = vld [vmem:[#allocation2 + $0x110] sm:$0xff]  ;;  %v569_v49 = vsel %vm432_vm3, %v3197_v2, %v568_v39  ;;  %v652_v50 = vsel %vm395_vm2, %v649_v28, %v651_v40  ;;  %v560_v51 = vsel %vm395_vm2, %v3195_v1, %v559_v41  ;;  %v857_v48 = vld [vmem:[#allocation2 + $0x108] sm:$0xff]  ;;  %s2155_s25 = scalar_lea.vmem %s2154_s9, 2048  ;;  %p2156_p5 = scmp.lt.s32.totalorder %s3372_s12, %s2154_s9 }
  0x6e   : > { %2058 = vmatprep.subr.bf16.mxu1 %v2032_v19  ;;  %1187 = vmatmul.mubr.f32.gmra.mrb[20].mxu0 %v846_v36  ;;  %573 = vst.msk [vmem:[#allocation2 + $0x220] sm:$0xff] %vm374_vm1, %v569_v49  ;;  %660 = vst.msk [vmem:[#allocation2 + $0x230] sm:$0xff] %vm374_vm1, %v652_v50  ;;  %v670_v1 = vsel %vm432_vm3, %v667_v35, %v669_v44  ;;  %v855_v2 = vld [vmem:[#allocation2 + $0xf8] sm:$0xff]  ;;  %v865_v47 = vld [vmem:[#allocation2 + $0x148] sm:$0xff]  ;;  %v2040_v55 = vpack.c.bf16 %v816_v53, %v815_v52  ;;  %p2157_p6 = scmp.lt.s32.totalorder %s2155_s25, %s2149_s24 }
  0x6f   : > { %1292 = vmatmul.mubr.f32.gmra.mrb[20].mxu1 %v848_v37  ;;  %564 = vst.msk [vmem:[#allocation2 + $0x218] sm:$0xff] %vm374_vm1, %v560_v51  ;;  %2035 = vmatpush3.bf16.msra.mxu0 %v2032_v19  ;;  %678 = vst.msk [vmem:[#allocation2 + $0x238] sm:$0xff] %vm374_vm1, %v670_v1  ;;  %v867_v54 = vld [vmem:[#allocation2 + $0x158] sm:$0xff]  ;;  %v817_v56 = vld [vmem:[%s3430_s2 + $0x450] sm:$0xff] }
  0x70   : > { %2066 = vmatpush3.bf16.msra.mxu1 %v2032_v19  ;;  %1191 = vmatprep.mubr.f32.mxu0 %v856_v45  ;;  %v818_v57 = vld [vmem:[%s3430_s2 + $0x458] sm:$0xff]  ;;  %v864_v58 = vld [vmem:[#allocation2 + $0x140] sm:$0xff]  ;;  %v866_v59 = vld [vmem:[#allocation2 + $0x150] sm:$0xff]  ;;  %p2158_p7 = por %p2157_p6, %p2156_p5 }
  0x71   : > { %1296 = vmatprep.mubr.f32.mxu1 %v858_v46  ;;  %2037 = vmatprep.subr.bf16.mxu0 %v2036_v42  ;;  %v874_v60 = vld [vmem:[#allocation2 + $0x190] sm:$0xff]  ;;  %v876_v61 = vld [vmem:[#allocation2 + $0x1a0] sm:$0xff]  ;;  %v2044_v62 = vpack.c.bf16 %v818_v57, %v817_v56  ;;  %v820_v0 = vld [vmem:[%s3430_s2 + $0x468] sm:$0xff] }
  0x72   : > { %2059 = vmatprep.subr.bf16.mxu1 %v2036_v42  ;;  %1192 = vmatmul.mubr.f32.gmra.mrb[22].mxu0 %v855_v2  ;;  %v819_v63 = vld [vmem:[%s3430_s2 + $0x460] sm:$0xff]  ;;  %v873_v3 = vld [vmem:[#allocation2 + $0x188] sm:$0xff]  ;;  %v875_v4 = vld [vmem:[#allocation2 + $0x198] sm:$0xff]  ;;  %p2159_p9 = pnand %p2158_p7, %p2152_p4 }
  0x73   : > { %1297 = vmatmul.mubr.f32.gmra.mrb[22].mxu1 %v857_v48  ;;  %2039 = vmatpush3.bf16.msra.mxu0 %v2036_v42  ;;  %v883_v5 = vld [vmem:[#allocation2 + $0x1d8] sm:$0xff]  ;;  %v885_v6 = vld [vmem:[#allocation2 + $0x1e8] sm:$0xff]  ;;  %v2048_v7 = vpack.c.bf16 %v820_v0, %v819_v63  ;;  %v821_v8 = vld [vmem:[%s3430_s2 + $0x470] sm:$0xff] }
  0x74   : > { %2067 = vmatpush3.bf16.msra.mxu1 %v2036_v42  ;;  %1196 = vmatprep.mubr.f32.mxu0 %v865_v47  ;;  %v822_v9 = vld [vmem:[%s3430_s2 + $0x478] sm:$0xff]  ;;  %v882_v10 = vld [vmem:[#allocation2 + $0x1d0] sm:$0xff]  ;;  %v884_v30 = vld [vmem:[#allocation2 + $0x1e0] sm:$0xff] }
  0x75   : > { %1301 = vmatprep.mubr.f32.mxu1 %v867_v54  ;;  %2041 = vmatprep.subr.bf16.mxu0 %v2040_v55  ;;  %v892_v11 = vld [vmem:[#allocation2 + $0x220] sm:$0xff]  ;;  %v894_v12 = vld [vmem:[#allocation2 + $0x230] sm:$0xff]  ;;  %v2052_v29 = vpack.c.bf16 %v822_v9, %v821_v8  ;;  %v893_v14 = vld [vmem:[#allocation2 + $0x228] sm:$0xff] }
  0x76   : > { %2060 = vmatprep.subr.bf16.mxu1 %v2040_v55  ;;  %1197 = vmatmul.mubr.f32.gmra.mrb[24].mxu0 %v864_v58  ;;  %v891_v13 = vld [vmem:[#allocation2 + $0x218] sm:$0xff]  ;;  %v832_v17 = vld [vmem:[#allocation2 + $0x40] sm:$0xff]  ;;  %v841_v19 = vld [vmem:[#allocation2 + $0x88] sm:$0xff] }
  0x77   : > { %1302 = vmatmul.mubr.f32.gmra.mrb[24].mxu1 %v866_v59  ;;  %2043 = vmatpush3.bf16.msra.mxu0 %v2040_v55  ;;  %v868_v18 = vld [vmem:[#allocation2 + $0x160] sm:$0xff]  ;;  %v877_v20 = vld [vmem:[#allocation2 + $0x1a8] sm:$0xff]  ;;  %v850_v21 = vld [vmem:[#allocation2 + $0xd0] sm:$0xff] }
  0x78   : > { %2068 = vmatpush3.bf16.msra.mxu1 %v2040_v55  ;;  %1201 = vmatprep.mubr.f32.mxu0 %v874_v60  ;;  %v886_v22 = vld [vmem:[#allocation2 + $0x1f0] sm:$0xff]  ;;  %v859_v23 = vld [vmem:[#allocation2 + $0x118] sm:$0xff]  ;;  %v1595_v27 = vld [vmem:[%s3431_s3] ss:$0 sm:$0xff] }
  0x79   : > { %1306 = vmatprep.mubr.f32.mxu1 %v876_v61  ;;  %2045 = vmatprep.subr.bf16.mxu0 %v2044_v62  ;;  %v895_v24 = vld [vmem:[#allocation2 + $0x238] sm:$0xff] }
  0x7a   : > { %2061 = vmatprep.subr.bf16.mxu1 %v2044_v62  ;;  %1202 = vmatmul.mubr.f32.gmra.mrb[26].mxu0 %v873_v3 }
  0x7b   : > { %1307 = vmatmul.mubr.f32.gmra.mrb[26].mxu1 %v875_v4  ;;  %2047 = vmatpush3.bf16.msra.mxu0 %v2044_v62 }
  0x7c   : > { %2069 = vmatpush3.bf16.msra.mxu1 %v2044_v62  ;;  %1206 = vmatprep.mubr.f32.mxu0 %v883_v5 }
  0x7d   : > { %1311 = vmatprep.mubr.f32.mxu1 %v885_v6  ;;  %2049 = vmatprep.subr.bf16.mxu0 %v2048_v7 }
  0x7e   : > { %2062 = vmatprep.subr.bf16.mxu1 %v2048_v7  ;;  %1207 = vmatmul.mubr.f32.gmra.mrb[28].mxu0 %v882_v10 }
  0x7f   : > { %1312 = vmatmul.mubr.f32.gmra.mrb[28].mxu1 %v884_v30  ;;  %2051 = vmatpush3.bf16.msra.mxu0 %v2048_v7 }
  0x80   : > { %2070 = vmatpush3.bf16.msra.mxu1 %v2048_v7  ;;  %1211 = vmatprep.mubr.f32.mxu0 %v892_v11 }
  0x81   : > { %1316 = vmatprep.mubr.f32.mxu1 %v894_v12  ;;  %2053 = vmatprep.subr.bf16.mxu0 %v2052_v29 }
  0x82   : > { %2063 = vmatprep.subr.bf16.mxu1 %v2052_v29  ;;  %1212 = vmatmul.mubr.f32.gmra.mrb[30].mxu0 %v891_v13 }
  0x83   : > { %1317 = vmatmul.mubr.f32.gmra.mrb[30].mxu1 %v893_v14  ;;  %2055 = vmatpush3.bf16.msra.mxu0 %v2052_v29 }
  0x84   : > { %2071 = vmatpush3.bf16.msra.mxu1 %v2052_v29  ;;  %1884 = vmatprep.mubr.f32.mxu0 %v832_v17 }
  0x85   : > { %1890 = vmatprep.mubr.f32.mxu1 %v868_v18 }
  0x86   : > { %1885 = vmatmul.mubr.f32.vlgmr.msra.gmra.mrb[32].mxu0 %v841_v19 }
  0x87   : > { %1891 = vmatmul.mubr.f32.vlgmr.msra.gmra.mrb[32].mxu1 %v877_v20  ;;  %1887 = vmatprep.mubr.f32.mxu0 %v850_v21 }
  0x88   : > { %1893 = vmatprep.mubr.f32.mxu1 %v886_v22 }
  0x8a   : > { %1888 = vmatmul.mubr.f32.gmra.mrb[34].mxu0 %v859_v23 }
  0x8b   : > { %1894 = vmatmul.mubr.f32.gmra.mrb[34].mxu1 %v895_v24 }
 0x115   : > { %v1692_v26 = vpop.f32.mrb[0].mxu1 }
 0x116   : > { %v1636_v25 = vpop.f32.mrb[0].mxu0  ;;  %v1693_v28 = vpop.f32.mrb[1].mxu1 }
 0x117   : > { %v1637_v16 = vpop.f32.mrb[1].mxu0  ;;  %v1694_v31 = vadd.f32 %v1693_v28, %v1692_v26 }
 0x118   : > { %v1638_v15 = vadd.f32 %v1637_v16, %v1636_v25 }
 0x119   : > { %v1695_v34 = vpop.f32.mrb[2].mxu1 }
 0x11a   : > { %v969_v32 = vadd.f32 %v1638_v15, %v1595_v27  ;;  %v1639_v33 = vpop.f32.mrb[2].mxu0  ;;  %v1696_v38 = vpop.f32.mrb[3].mxu1 }
 0x11b   : > { %v1640_v35 = vpop.f32.mrb[3].mxu0  ;;  %v1697_v39 = vadd.f32 %v1696_v38, %v1695_v34 }
 0x11c   : > { %v1074_v36 = vadd.f32 %v1694_v31, %v969_v32  ;;  %v1641_v37 = vadd.f32 %v1640_v35, %v1639_v33 }
 0x11d   : > { %v1698_v42 = vpop.f32.mrb[4].mxu1 }
 0x11e   : > { %v974_v40 = vadd.f32 %v1641_v37, %v1595_v27  ;;  %v1642_v41 = vpop.f32.mrb[4].mxu0  ;;  %v1699_v46 = vpop.f32.mrb[5].mxu1 }
 0x11f   : > { %v1643_v43 = vpop.f32.mrb[5].mxu0  ;;  %v1700_v49 = vadd.f32 %v1699_v46, %v1698_v42 }
 0x120   : > { %v1079_v44 = vadd.f32 %v1697_v39, %v974_v40  ;;  %v1644_v45 = vadd.f32 %v1643_v43, %v1642_v41 }
 0x121   : > { %v1701_v52 = vpop.f32.mrb[6].mxu1 }
 0x122   : > { %v979_v50 = vadd.f32 %v1644_v45, %v1595_v27  ;;  %v1702_v48 = vpop.f32.mrb[7].mxu1 }
 0x123   : > { %v1645_v51 = vpop.f32.mrb[6].mxu0  ;;  %v1703_v47 = vadd.f32 %v1702_v48, %v1701_v52 }
 0x124   : > { %v1646_v53 = vpop.f32.mrb[7].mxu0  ;;  %v1084_v1 = vadd.f32 %v1700_v49, %v979_v50 }
 0x125   : > { %v1647_v2 = vadd.f32 %v1646_v53, %v1645_v51 }
 0x126   : > { %v1704_v56 = vpop.f32.mrb[8].mxu1 }
 0x127   : > { %v984_v54 = vadd.f32 %v1647_v2, %v1595_v27  ;;  %v1648_v55 = vpop.f32.mrb[8].mxu0  ;;  %v1705_v60 = vpop.f32.mrb[9].mxu1 }
 0x128   : > { %v1649_v57 = vpop.f32.mrb[9].mxu0  ;;  %v1706_v61 = vadd.f32 %v1705_v60, %v1704_v56 }
 0x129   : > { %v1089_v58 = vadd.f32 %v1703_v47, %v984_v54  ;;  %v1650_v59 = vadd.f32 %v1649_v57, %v1648_v55 }
 0x12b   : > { %v989_v62 = vadd.f32 %v1650_v59, %v1595_v27  ;;  %v1651_v63 = vpop.f32.mrb[10].mxu0 }
 0x12c   : > { %v1652_v4 = vpop.f32.mrb[11].mxu0 }
 0x12d   : > { %v1707_v0 = vpop.f32.mrb[10].mxu1  ;;  %v1094_v3 = vadd.f32 %v1706_v61, %v989_v62  ;;  %v1653_v6 = vadd.f32 %v1652_v4, %v1651_v63 }
 0x12e   : > { %v1708_v5 = vpop.f32.mrb[11].mxu1 }
 0x12f   : > { %v1709_v7 = vadd.f32 %v1708_v5, %v1707_v0  ;;  %v994_v8 = vadd.f32 %v1653_v6, %v1595_v27 }
 0x130   : > { %v1654_v9 = vpop.f32.mrb[12].mxu0 }
 0x131   : > { %v1710_v10 = vpop.f32.mrb[12].mxu1  ;;  %v1655_v30 = vpop.f32.mrb[13].mxu0  ;;  %v1099_v12 = vadd.f32 %v1709_v7, %v994_v8 }
 0x132   : > { %v1711_v11 = vpop.f32.mrb[13].mxu1  ;;  %v1656_v29 = vadd.f32 %v1655_v30, %v1654_v9 }
 0x133   : > { %v1712_v13 = vadd.f32 %v1711_v11, %v1710_v10 }
 0x134   : > { %v999_v14 = vadd.f32 %v1656_v29, %v1595_v27 }
 0x135   : > { %v1657_v17 = vpop.f32.mrb[14].mxu0 }
 0x136   : > { %v1713_v18 = vpop.f32.mrb[14].mxu1  ;;  %v1104_v19 = vadd.f32 %v1712_v13, %v999_v14  ;;  %v1658_v20 = vpop.f32.mrb[15].mxu0 }
 0x137   : > { %v1714_v21 = vpop.f32.mrb[15].mxu1  ;;  %v1659_v22 = vadd.f32 %v1658_v20, %v1657_v17 }
 0x138   : > { %v1715_v23 = vadd.f32 %v1714_v21, %v1713_v18 }
 0x139   : > { %v1004_v24 = vadd.f32 %v1659_v22, %v1595_v27  ;;  %v1748_v25 = vpop.f32.mrb[16].mxu0 }
 0x13a   : > { %v1804_v26 = vpop.f32.mrb[16].mxu1  ;;  %v1749_v16 = vpop.f32.mrb[17].mxu0 }
 0x13b   : > { %v1805_v15 = vpop.f32.mrb[17].mxu1  ;;  %v3356_v28 = vadd.f32 %v1715_v23, %v1004_v24  ;;  %v1750_v31 = vadd.f32 %v1749_v16, %v1748_v25 }
 0x13c   : > { %v1806_v32 = vadd.f32 %v1805_v15, %v1804_v26 }
 0x13d   : > { %v1179_v33 = vadd.f32 %v1750_v31, %v1074_v36  ;;  %v1751_v34 = vpop.f32.mrb[18].mxu0 }
 0x13e   : > { %v1807_v35 = vpop.f32.mrb[18].mxu1  ;;  %v1752_v37 = vpop.f32.mrb[19].mxu0 }
 0x13f   : > { %v1808_v38 = vpop.f32.mrb[19].mxu1  ;;  %v1753_v39 = vadd.f32 %v1752_v37, %v1751_v34  ;;  %v1284_v41 = vadd.f32 %v1806_v32, %v1179_v33 }
 0x140   : > { %v1809_v40 = vadd.f32 %v1808_v38, %v1807_v35 }
 0x141   : > { %v1184_v42 = vadd.f32 %v1753_v39, %v1079_v44  ;;  %v1754_v43 = vpop.f32.mrb[20].mxu0 }
 0x142   : > { %v1810_v45 = vpop.f32.mrb[20].mxu1  ;;  %v1755_v27 = vpop.f32.mrb[21].mxu0 }
 0x143   : > { %v1811_v46 = vpop.f32.mrb[21].mxu1  ;;  %v1756_v49 = vadd.f32 %v1755_v27, %v1754_v43  ;;  %v1289_v51 = vadd.f32 %v1809_v40, %v1184_v42 }
 0x144   : > { %v1812_v50 = vadd.f32 %v1811_v46, %v1810_v45 }
 0x145   : > { %v1189_v52 = vadd.f32 %v1756_v49, %v1084_v1  ;;  %v1757_v53 = vpop.f32.mrb[22].mxu0 }
 0x146   : > { %v1813_v2 = vpop.f32.mrb[22].mxu1  ;;  %v1758_v48 = vpop.f32.mrb[23].mxu0 }
 0x147   : > { %v1814_v36 = vpop.f32.mrb[23].mxu1  ;;  %v1759_v47 = vadd.f32 %v1758_v48, %v1757_v53  ;;  %v3358_v55 = vadd.f32 %v1812_v50, %v1189_v52 }
 0x148   : > { %v1815_v54 = vadd.f32 %v1814_v36, %v1813_v2 }
 0x149   : > { %v1194_v56 = vadd.f32 %v1759_v47, %v1089_v58  ;;  %v1760_v57 = vpop.f32.mrb[24].mxu0 }
 0x14a   : > { %v1816_v59 = vpop.f32.mrb[24].mxu1  ;;  %v1761_v44 = vpop.f32.mrb[25].mxu0 }
 0x14b   : > { %v1817_v60 = vpop.f32.mrb[25].mxu1  ;;  %v1762_v61 = vadd.f32 %v1761_v44, %v1760_v57  ;;  %v1299_v63 = vadd.f32 %v1815_v54, %v1194_v56 }
 0x14c   : > { %v1818_v62 = vadd.f32 %v1817_v60, %v1816_v59 }
 0x14d   : > { %v1199_v0 = vadd.f32 %v1762_v61, %v1094_v3  ;;  %v1763_v4 = vpop.f32.mrb[26].mxu0 }
 0x14e   : > { %v1819_v5 = vpop.f32.mrb[26].mxu1  ;;  %v1764_v1 = vpop.f32.mrb[27].mxu0 }
 0x14f   : > { %v1820_v6 = vpop.f32.mrb[27].mxu1  ;;  %v1765_v7 = vadd.f32 %v1764_v1, %v1763_v4  ;;  %v1304_v9 = vadd.f32 %v1818_v62, %v1199_v0 }
 0x150   : > { %v1821_v8 = vadd.f32 %v1820_v6, %v1819_v5 }
 0x151   : > { %v1204_v10 = vadd.f32 %v1765_v7, %v1099_v12  ;;  %v1766_v30 = vpop.f32.mrb[28].mxu0 }
 0x152   : > { %v1822_v58 = vpop.f32.mrb[28].mxu1  ;;  %v1767_v11 = vpop.f32.mrb[29].mxu0 }
 0x153   : > { %v1823_v29 = vpop.f32.mrb[29].mxu1  ;;  %v1768_v13 = vadd.f32 %v1767_v11, %v1766_v30  ;;  %v1309_v17 = vadd.f32 %v1821_v8, %v1204_v10 }
 0x154   : > { %v1824_v14 = vadd.f32 %v1823_v29, %v1822_v58 }
 0x155   : > { %v1209_v3 = vadd.f32 %v1768_v13, %v1104_v19  ;;  %v1769_v18 = vpop.f32.mrb[30].mxu0 }
 0x156   : > { %v1825_v20 = vpop.f32.mrb[30].mxu1  ;;  %v1770_v21 = vpop.f32.mrb[31].mxu0 }
 0x157   : > { %v1826_v22 = vpop.f32.mrb[31].mxu1  ;;  %v1771_v23 = vadd.f32 %v1770_v21, %v1769_v18  ;;  %v1314_v25 = vadd.f32 %v1824_v14, %v1209_v3 }
 0x158   : > { %v1827_v24 = vadd.f32 %v1826_v22, %v1825_v20 }
 0x159   : > { %v1214_v12 = vadd.f32 %v1771_v23, %v3356_v28  ;;  %v1886_v26 = vpop.f32.mrb[32].mxu0 }
 0x15a   : > { %v1892_v16 = vpop.f32.mrb[32].mxu1  ;;  %v1394_v15 = vadd.f32 %v1886_v26, %v1289_v51  ;;  %v1388_v32 = vpop.f32.mrb[33].mxu0 }
 0x15b   : > { %v1414_v31 = vadd.f32 %v1892_v16, %v1309_v17  ;;  %v1408_v19 = vpop.f32.mrb[33].mxu1  ;;  %v1389_v33 = vadd.f32 %v1388_v32, %v1284_v41  ;;  %v1319_v35 = vadd.f32 %v1827_v24, %v1214_v12 }
 0x15c   : > { %v1409_v34 = vadd.f32 %v1408_v19, %v1304_v9  ;;  %v1428_v37 = vmax.f32 %v1394_v15, 0.0 }
 0x15d   : > { %v1432_v38 = vmax.f32 %v1414_v31, 0.0  ;;  %v1427_v39 = vmax.f32 %v1389_v33, 0.0  ;;  %v1889_v42 = vpop.f32.mrb[34].mxu0 }
 0x15e   : > { %v1431_v40 = vmax.f32 %v1409_v34, 0.0  ;;  %v1895_v43 = vpop.f32.mrb[34].mxu1  ;;  %1436 = vst [vmem:[%s259_s19 + $0x8] sm:$0xff] %v1428_v37  ;;  %v1404_v28 = vadd.f32 %v1889_v42, %v1299_v63  ;;  %v1398_v27 = vpop.f32.mrb[35].mxu0 }
 0x15f   : > { %1440 = vst [vmem:[%s259_s19 + $0x28] sm:$0xff] %v1432_v38  ;;  %v1424_v45 = vadd.f32 %v1895_v43, %v1319_v35  ;;  %v1418_v46 = vpop.f32.mrb[35].mxu1  ;;  %1435 = vst [vmem:[%s259_s19] sm:$0xff] %v1427_v39  ;;  %v1399_v41 = vadd.f32 %v1398_v27, %v3358_v55 }
 0x160   : > { %1439 = vst [vmem:[%s259_s19 + $0x20] sm:$0xff] %v1431_v40  ;;  %v1419_v49 = vadd.f32 %v1418_v46, %v1314_v25  ;;  %v1430_v50 = vmax.f32 %v1404_v28, 0.0 }
 0x161   : > { %v1434_v51 = vmax.f32 %v1424_v45, 0.0  ;;  %v1429_v52 = vmax.f32 %v1399_v41, 0.0 }
 0x162   : > { %v1433_v53 = vmax.f32 %v1419_v49, 0.0  ;;  %1438 = vst [vmem:[%s259_s19 + $0x18] sm:$0xff] %v1430_v50 }
 0x163   : > { %1442 = vst [vmem:[%s259_s19 + $0x38] sm:$0xff] %v1434_v51  ;;  %1437 = vst [vmem:[%s259_s19 + $0x10] sm:$0xff] %v1429_v52 }
 0x164   : > { %1441 = vst [vmem:[%s259_s19 + $0x30] sm:$0xff] %v1433_v53 }
 0x165   : > { %2162 = shalt.err (!%p2159_p9)
}
 0x166   : > { %s2163_s10 = scalar_lea.hbm %s3370_s23, 1024  ;;  %s2167_s8 = scalar_lea.hbm %s3432_s4, 8192 }
 0x167   : > { %p2164_p10 = scmp.ne.s32.totalorder %s3370_s23, %s2163_s10  ;;  %p2168_p13 = scmp.lt.u32.totalorder %s3370_s23, %s3432_s4 }
 0x168   : > { %p2169_p0 = scmp.lt.u32.totalorder %s2167_s8, %s2163_s10  ;;  %p2171_p2 = scmp.lt.u32.totalorder %s2163_s10, %s3370_s23 }
 0x169   : > { %p2165_p11 = pnand %p2164_p10, %p2325_p3 }
 0x16a   : > { %p2170_p1 = por %p2169_p0, %p2168_p13 }
 0x16b   : > { %p2166_p12 = pneg %p2165_p11 }
 0x16c   : > { %p2172_p4 = por %p2171_p2, %p2170_p1 }
 0x16e   : > { %p2173_p5 = pnand %p2172_p4, %p2166_p12 }
 0x170   : > { %2176 = shalt.err (!%p2173_p5)
}
 0x171   : > { %s2247_s18 = smov 128   ;;  %s2248_s19 = smov 8  }
 0x172   : > { %2075 = dma.vmem_to_hbm [thread:$0]  (%p2325_p3), %s3372_s12, 1024, %s3370_s23, %s3376_s14, %s2247_s18, %s2247_s18, %s2248_s19  }
 0x173 PF: > { %p2081_p6 = scmp.ge.s32.totalorder %s2243_s22, 2  ;;  %s1475_s5 = sand.u32 1, %s2215_s15  }
 0x174   : > { %s1476_s6 = scalar_lea.sflag [#allocation4], %s1475_s5 }
 0x175   : > { %p2078_p7 = pnand %p2081_p6, %p2334_p8 }
 0x177   : > { %2210 = dma.done.wait (!%p2078_p7), %s1476_s6, 1024  }
 0x178   : > { %2212 = vsyncadd (!%p2078_p7), %s1476_s6, 4294966272  ;;  %s17_s22 = sadd.s32 1, %s2243_s22   ;;  %s3442_s28 = sld [smem:[#allocation6_spill]] }
 0x179   : > { %p14_p9 = scmp.ge.s32.totalorder %s17_s22, 10   ;;  %s3443_s12 = sld [smem:[#allocation7_spill]] }
 0x17a   : > { %s3444_s15 = smov %s2219_s16  ;;  %s3445_s16 = smov %s2223_s17 }
 0x17b   : > { %s3446_s17 = smov %s2343_s7  ;;  %s3447_s18 = smov %s2235_s20 }
 0x17c   : > { %s3448_s19 = smov %s2239_s21  ;;  %16 = sbr.rel (!%p14_p9) target bundleno = 5 (0x5), region = 80 }
 0x17e   : > { %s3449_s20 = smov %s3442_s28 }
 0x17f   : > { %s3450_s21 = smov %s3443_s12 }
 0x183   :  { %1481 = vsyncpa [#allocation4], 1 }
 0x184   :  { %1483 = vsyncpa [#allocation4 + $0x1], 1 }

</bundles_post_ra>
